<compile_context>
chip_gen: v5e
topology: v5e:2x2
jax: 0.10.0
libtpu: 0.0.40
codegen_flags: <defaults>
</compile_context>

<pallas_src>
import functools

import jax
import jax.numpy as jnp
from jax.experimental import pallas as pl
from jax.experimental.pallas import tpu as pltpu


_MIB = 1024 * 1024
_VMEM_LIMIT_BYTES = 48 * _MIB  # generation-safe; see header comment.


def _round_up(x, m):
    return ((x + m - 1) // m) * m


def _const_spec(shape, index_map):
    """BlockSpec for a grid-invariant (weight) operand.

    Single-buffered when the installed Pallas supports pipeline_mode; falls back
    to the default (double-buffered) BlockSpec otherwise.
    """
    try:
        return pl.BlockSpec(shape, index_map,
                            pipeline_mode=pl.Buffered(buffer_count=1))
    except Exception:  # pipeline_mode / Buffered(1) not supported -> default.
        return pl.BlockSpec(shape, index_map)


# --------------------------------------------------------------------------- #
# Stage 1: fused theta|phi|g 1x1x1-conv projection, token-major bf16 output.  #
# --------------------------------------------------------------------------- #
def _proj_kernel(x_ref, w_ref, b_ref, o_ref):
    """Project one token tile.

    x_ref : (1, C, TS)    f32   input activations (channels-major, as stored)
    w_ref : (C, 3*Ep)     bf16  fused [W_theta | W_phi | W_g]^T; the gaussian
                                temperature E**-0.5 is folded into the theta
                                third; embed dim zero-padded to Ep.
    b_ref : (1, 3*Ep)     f32   fused (scaled / zero-padded) bias
    o_ref : (1, TS, 3*Ep) bf16  token-major [theta | phi | g]
    """
    xt = x_ref[0].astype(jnp.bfloat16)                              # (C, TS)
    proj = jax.lax.dot_general(                                     # x^T @ W
        xt, w_ref[...], (((0,), (0,)), ((), ())),
        preferred_element_type=jnp.float32)                         # (TS, 3Ep)
    o_ref[0] = (proj + b_ref[...]).astype(o_ref.dtype)


# --------------------------------------------------------------------------- #
# Stage 2: flash attention (online softmax) + fused W projection + BN partials #
# --------------------------------------------------------------------------- #
def _flash_kernel(q_ref, k_ref, v_ref, ww_ref, bw_ref, o_ref, stats_ref,
                  m_scr, l_scr, acc_scr, *, exp_dtype):
    """One (batch, q-tile, kv-tile) step.

    q_ref    : (1, TQ, Ep) bf16  theta tile (temperature pre-folded)
    k_ref    : (1, TK, Ep) bf16  phi tile
    v_ref    : (1, TK, Ep) bf16  g tile
    ww_ref   : (C, Ep)     bf16  W projection weight (zero-padded cols)
    bw_ref   : (C, 1)      f32   W projection bias
    o_ref    : (1, C, TQ)  f32   W(y) tile (pre-BN, pre-residual), channels-major
    stats_ref: (1, 1, 2, C) f32  per-channel [sum ; sum-of-squares] of W(y)
    """
    ki = pl.program_id(2)
    nk = pl.num_programs(2)

    # ---- init online-softmax state once per (n, q-tile) ----------------------
    @pl.when(ki == 0)
    def _init():
        m_scr[...] = jnp.full_like(m_scr, -jnp.inf)
        l_scr[...] = jnp.zeros_like(l_scr)
        acc_scr[...] = jnp.zeros_like(acc_scr)

    # ---- scores + online softmax (canonical QK^T / PV matmuls) ---------------
    s = jax.lax.dot_general(                                        # theta @ phi^T
        q_ref[0], k_ref[0], (((1,), (1,)), ((), ())),
        preferred_element_type=jnp.float32)                         # (TQ, TK)

    m_prev = m_scr[...]
    m_new = jnp.maximum(m_prev, jnp.max(s, axis=-1, keepdims=True))
    alpha = jnp.exp(m_prev - m_new)
    # exp_dtype=bfloat16 hits the faster bf16 EUP path on v6e/v7x; keep float32
    # on v5e (no bf16 EUP).  l / acc accumulation stays f32 either way.
    p = jnp.exp((s - m_new).astype(exp_dtype)).astype(jnp.float32)
    l_scr[...] = alpha * l_scr[...] + jnp.sum(p, axis=-1, keepdims=True)
    acc_scr[...] = alpha * acc_scr[...] + jnp.dot(
        p.astype(jnp.bfloat16), v_ref[0], preferred_element_type=jnp.float32)
    m_scr[...] = m_new

    # ---- finalize: normalize, W projection, lane-dense BN partial stats ------
    @pl.when(ki == nk - 1)
    def _finalize():
        # TODO(synk): approx reciprocal is fine at the stated tolerance; use
        # approx=False (or one Newton step) if tighter accuracy is ever needed.
        y = acc_scr[...] * pl.reciprocal(l_scr[...], approx=True)   # (TQ, Ep)
        wy = jax.lax.dot_general(                                   # Ww @ y^T
            ww_ref[...], y.astype(jnp.bfloat16), (((1,), (1,)), ((), ())),
            preferred_element_type=jnp.float32)                     # (C, TQ)
        wy = wy + bw_ref[...]
        o_ref[0] = wy.astype(o_ref.dtype)
        stats_ref[0, 0, 0, :] = jnp.sum(wy, axis=1)                 # (C,)
        stats_ref[0, 0, 1, :] = jnp.sum(wy * wy, axis=1)            # (C,)


def _pick_tile(S, max_tile):
    """Largest multiple of 128 dividing S and <= max_tile; else S (untiled)."""
    if S % 128 != 0:
        # TODO(synk): pad S to a 128 multiple with masking instead of going
        # untiled; untiled can blow VMEM for large, badly-aligned S.
        return S
    t = 128
    while t * 2 <= max_tile and S % (t * 2) == 0:
        t *= 2
    return t


def nonlocal_forward(x, params, *, max_tq=1024, max_tk=512, max_ts=512,
                     eps=1e-5, exp_dtype=jnp.float32):
    """NonLocal forward. x: (N, C, T, H, W) float32, returns same shape/dtype."""
    N, C, T, H, W = x.shape
    S = T * H * W
    E = params["wt"].shape[0]
    Ep = _round_up(E, 128)                     # lane-pad embed dim (zero-pad => exact)

    x3 = x.reshape(N, C, S)                    # free reshape, stays channels-major

    # ---- weight prep (once, outside the kernels) ------------------------------
    scale = float(E) ** -0.5                   # gaussian temperature, folded into theta

    def pad_w(w):                              # (E, C) -> (C, Ep), zero-padded
        return jnp.pad(w, ((0, Ep - E), (0, 0))).T

    def pad_b(b):                              # (E,) -> (Ep,), zero-padded
        return jnp.pad(b, (0, Ep - E))

    w_tpg = jnp.concatenate(
        [pad_w(params["wt"] * scale), pad_w(params["wp"]), pad_w(params["wg"])],
        axis=1).astype(jnp.bfloat16)                                       # (C, 3Ep)
    b_tpg = jnp.concatenate(
        [pad_b(params["bt"] * scale), pad_b(params["bp"]), pad_b(params["bg"])]
    ).reshape(1, 3 * Ep).astype(jnp.float32)                               # (1, 3Ep)
    ww = jnp.pad(params["ww"], ((0, 0), (0, Ep - E))).astype(jnp.bfloat16)  # (C, Ep)
    bw = params["bw"].reshape(C, 1).astype(jnp.float32)                     # (C, 1)

    # ---- stage 1: theta|phi|g projection (once per token) ---------------------
    ts = _pick_tile(S, max_ts)
    ns = S // ts
    proj = pl.pallas_call(
        _proj_kernel,
        out_shape=jax.ShapeDtypeStruct((N, S, 3 * Ep), jnp.bfloat16),
        grid_spec=pltpu.PrefetchScalarGridSpec(
            num_scalar_prefetch=0,
            grid=(N, ns),
            in_specs=[
                pl.BlockSpec((1, C, ts), lambda n, si: (n, 0, si)),
                _const_spec((C, 3 * Ep), lambda n, si: (0, 0)),
                _const_spec((1, 3 * Ep), lambda n, si: (0, 0)),
            ],
            out_specs=pl.BlockSpec((1, ts, 3 * Ep), lambda n, si: (n, si, 0)),
        ),
        compiler_params=pltpu.CompilerParams(
            dimension_semantics=("parallel", "parallel"),
            vmem_limit_bytes=_VMEM_LIMIT_BYTES),
    )(x3, w_tpg, b_tpg)

    # ---- stage 2: flash attention + fused W projection + BN partial stats -----
    tq = _pick_tile(S, max_tq)
    tk = _pick_tile(S, max_tk)
    nq, nk = S // tq, S // tk

    kern = functools.partial(_flash_kernel, exp_dtype=exp_dtype)
    wy, stats = pl.pallas_call(
        kern,
        out_shape=(
            jax.ShapeDtypeStruct((N, C, S), jnp.float32),
            jax.ShapeDtypeStruct((N, nq, 2, C), jnp.float32),
        ),
        grid_spec=pltpu.PrefetchScalarGridSpec(
            num_scalar_prefetch=0,
            grid=(N, nq, nk),
            in_specs=[
                # theta / phi / g all view the same proj array at lane-aligned
                # block offsets along the last (3*Ep) axis.
                pl.BlockSpec((1, tq, Ep), lambda n, qi, ki: (n, qi, 0)),  # theta
                pl.BlockSpec((1, tk, Ep), lambda n, qi, ki: (n, ki, 1)),  # phi
                pl.BlockSpec((1, tk, Ep), lambda n, qi, ki: (n, ki, 2)),  # g
                _const_spec((C, Ep), lambda n, qi, ki: (0, 0)),           # ww
                _const_spec((C, 1), lambda n, qi, ki: (0, 0)),            # bw
            ],
            out_specs=[
                pl.BlockSpec((1, C, tq), lambda n, qi, ki: (n, 0, qi)),
                pl.BlockSpec((1, 1, 2, C), lambda n, qi, ki: (n, qi, 0, 0)),
            ],
            scratch_shapes=[
                pltpu.VMEM((tq, 1), jnp.float32),    # running max m
                pltpu.VMEM((tq, 1), jnp.float32),    # running sum l
                pltpu.VMEM((tq, Ep), jnp.float32),   # un-normalized output acc
            ],
        ),
        compiler_params=pltpu.CompilerParams(
            dimension_semantics=("parallel", "parallel", "arbitrary"),
            vmem_limit_bytes=_VMEM_LIMIT_BYTES),
    )(proj, proj, proj, ww, bw)

    # ---- epilogue: BatchNorm3d (training-mode batch stats, biased var, as a
    # fresh PyTorch BN in .train()) combined from the per-(batch, q-tile)
    # partial sums, then one normalize + residual elementwise pass.
    # TODO(synk): running_mean / running_var buffers (momentum=0.9) are not
    # produced; only the forward normalization is implemented.
    # TODO(synk): E[x^2]-mean^2 in f32 can cancel for huge N*S / large-mean
    # channels; switch to a Welford-style merge of per-tile (count, mean, M2)
    # if that regime matters.
    count = float(N * S)
    mean = jnp.sum(stats[:, :, 0, :], axis=(0, 1)) / count                  # (C,)
    msq = jnp.sum(stats[:, :, 1, :], axis=(0, 1)) / count
    var = jnp.maximum(msq - mean * mean, 0.0)
    inv = jax.lax.rsqrt(var + eps)
    g_ = (params["gamma"] * inv)[None, :, None]
    b_ = (params["beta"] - params["gamma"] * inv * mean)[None, :, None]
    z = g_ * wy + b_ + x3
    return z.reshape(N, C, T, H, W)


def nonlocal_reference(x, params, eps=1e-5):
    """Pure-JAX fp32 reference mirroring the PyTorch forward, for validation."""
    N, C, T, H, W = x.shape
    S = T * H * W
    E = params["wt"].shape[0]
    xf = x.reshape(N, C, S)
    theta = jnp.einsum("ec,ncs->nes", params["wt"], xf) + params["bt"][None, :, None]
    phi = jnp.einsum("ec,ncs->nes", params["wp"], xf) + params["bp"][None, :, None]
    g = jnp.einsum("ec,ncs->nes", params["wg"], xf) + params["bg"][None, :, None]
    tp = jnp.einsum("nei,nej->nij", theta, phi) * (float(E) ** -0.5)
    attn = jax.nn.softmax(tp, axis=-1)
    y = jnp.einsum("nej,nij->nei", g, attn)                         # bmm(g, attn^T)
    wy = jnp.einsum("ce,nes->ncs", params["ww"], y) + params["bw"][None, :, None]
    mean = jnp.mean(wy, axis=(0, 2), keepdims=True)
    var = jnp.mean((wy - mean) ** 2, axis=(0, 2), keepdims=True)    # biased, like BN
    bn = (params["gamma"][None, :, None] * (wy - mean) * jax.lax.rsqrt(var + eps)
          + params["beta"][None, :, None])
    return bn.reshape(N, C, T, H, W) + x


if __name__ == "__main__":
    # Small shapes consistent with the module (dim=3, embed_dim = in_channels // 2).
    # S = 256 with 128-tiles exercises the (N, q-tile, kv-tile) flash grid and the
    # projection grid.
    N, C, T, H, W = 2, 64, 4, 8, 8
    E = C // 2

    key = jax.random.PRNGKey(0)
    ks = jax.random.split(key, 11)
    x = jax.random.normal(ks[0], (N, C, T, H, W), jnp.float32)

    # Synthetic parameters. Nonzero BN gamma so the block is non-trivial (the
    # PyTorch init zeroes BN gamma, which would make the block an identity).
    params = {
        "wt": 0.15 * jax.random.normal(ks[1], (E, C), jnp.float32),
        "bt": 0.05 * jax.random.normal(ks[2], (E,), jnp.float32),
        "wp": 0.15 * jax.random.normal(ks[3], (E, C), jnp.float32),
        "bp": 0.05 * jax.random.normal(ks[4], (E,), jnp.float32),
        "wg": 0.15 * jax.random.normal(ks[5], (E, C), jnp.float32),
        "bg": 0.05 * jax.random.normal(ks[6], (E,), jnp.float32),
        "ww": 0.15 * jax.random.normal(ks[7], (C, E), jnp.float32),
        "bw": 0.05 * jax.random.normal(ks[8], (C,), jnp.float32),
        "gamma": 1.0 + 0.1 * jax.random.normal(ks[9], (C,), jnp.float32),
        "beta": 0.1 * jax.random.normal(ks[10], (C,), jnp.float32),
    }

    # Small tiles for the test so the grid actually iterates (nq=2, nk=2);
    # production defaults (max_tq=1024, max_tk=512) keep tq >> tk.
    fwd = jax.jit(functools.partial(nonlocal_forward,
                                    max_tq=128, max_tk=128, max_ts=128))
    out = jax.block_until_ready(fwd(x, params))

    ref = nonlocal_reference(x, params)
    assert out.shape == x.shape and out.dtype == x.dtype

    # bf16 matmul operands + BN (which divides by a small per-channel std,
    # amplifying absolute error) need looser elementwise tolerances than fp32;
    # the relative Frobenius norm check keeps the comparison tight.
    rel = jnp.linalg.norm(out - ref) / jnp.linalg.norm(ref)
    ok = bool(rel < 2e-2) and bool(jnp.allclose(out, ref, atol=1e-1, rtol=1e-1))
    if not ok:
        raise AssertionError(
            f"Pallas kernel output does not match reference (rel_fro={float(rel):.3e})")
    print("KERNEL_OK")
</pallas_src>

<mosaic_0001>
module attributes {stable_mosaic.version = 11 : i64} {
  func.func @_proj_kernel(%arg0: i32, %arg1: i32, %arg2: memref<1x64x128xf32, #tpu.memory_space<vmem>>, %arg3: memref<64x384xbf16, #tpu.memory_space<vmem>>, %arg4: memref<1x384xf32, #tpu.memory_space<vmem>>, %arg5: memref<1x128x384xbf16, #tpu.memory_space<vmem>>) attributes {dimension_semantics = [#tpu.dimension_semantics<parallel>, #tpu.dimension_semantics<parallel>], iteration_bounds = array<i64: 2, 2>, scalar_prefetch = 0 : i64, scratch_operands = 0 : i64, tpu.core_type = #tpu.core_type<tc>, window_params = [{transform_indices = @transform_0, window_bounds = array<i64: 1, 64, 128>}, {pipeline_mode = #tpu.pipeline_mode<synchronous>, transform_indices = @transform_1, window_bounds = array<i64: 64, 384>}, {pipeline_mode = #tpu.pipeline_mode<synchronous>, transform_indices = @transform_2, window_bounds = array<i64: 1, 384>}, {transform_indices = @transform_3, window_bounds = array<i64: 1, 128, 384>}]} {
    %c0 = arith.constant 0 : index
    %c0_0 = arith.constant 0 : index
    %c0_1 = arith.constant 0 : index
    %0 = vector.load %arg2[%c0, %c0_0, %c0_1] : memref<1x64x128xf32, #tpu.memory_space<vmem>>, vector<1x64x128xf32>
    %1 = vector.shape_cast %0 : vector<1x64x128xf32> to vector<64x128xf32>
    %2 = arith.truncf %1 : vector<64x128xf32> to vector<64x128xbf16>
    %c0_2 = arith.constant 0 : index
    %c0_3 = arith.constant 0 : index
    %3 = vector.load %arg3[%c0_2, %c0_3] : memref<64x384xbf16, #tpu.memory_space<vmem>>, vector<64x384xbf16>
    %cst = arith.constant dense<0.000000e+00> : vector<128x384xf32>
    %4 = tpu.matmul %2, %3, %cst {dimension_numbers = #tpu.dot_dimension_numbers<[0], [0], [1], [1], [0, 1, 1, 1], [], []>} : vector<64x128xbf16>, vector<64x384xbf16>, vector<128x384xf32> -> vector<128x384xf32>
    %c0_4 = arith.constant 0 : index
    %c0_5 = arith.constant 0 : index
    %5 = vector.load %arg4[%c0_4, %c0_5] : memref<1x384xf32, #tpu.memory_space<vmem>>, vector<1x384xf32>
    %6 = vector.broadcast %5 : vector<1x384xf32> to vector<128x384xf32>
    %7 = arith.addf %4, %6 : vector<128x384xf32>
    %8 = arith.truncf %7 : vector<128x384xf32> to vector<128x384xbf16>
    %c0_6 = arith.constant 0 : index
    %c0_7 = arith.constant 0 : index
    %c0_8 = arith.constant 0 : index
    %9 = vector.load %arg5[%c0_6, %c0_7, %c0_8] : memref<1x128x384xbf16, #tpu.memory_space<vmem>>, vector<1x128x384xbf16>
    %10 = vector.shape_cast %9 : vector<1x128x384xbf16> to vector<128x384xbf16>
    %11 = vector.shape_cast %8 : vector<128x384xbf16> to vector<1x128x384xbf16>
    tpu.vector_store %arg5[%c0_6, %c0_7, %c0_8], %11 {strides = array<i32>} : memref<1x128x384xbf16, #tpu.memory_space<vmem>>, vector<1x128x384xbf16>,
    return
  }
  func.func @transform_0(%arg0: i32, %arg1: i32) -> (i32, i32, i32) {
    %c0_i32 = arith.constant 0 : i32
    %c0_i32_0 = arith.constant 0 : i32
    return %arg0, %c0_i32, %arg1 : i32, i32, i32
  }
  func.func @transform_1(%arg0: i32, %arg1: i32) -> (i32, i32) {
    %c0_i32 = arith.constant 0 : i32
    %c0_i32_0 = arith.constant 0 : i32
    %c0_i32_1 = arith.constant 0 : i32
    return %c0_i32, %c0_i32_0 : i32, i32
  }
  func.func @transform_2(%arg0: i32, %arg1: i32) -> (i32, i32) {
    %c0_i32 = arith.constant 0 : i32
    %c0_i32_0 = arith.constant 0 : i32
    %c0_i32_1 = arith.constant 0 : i32
    return %c0_i32, %c0_i32_0 : i32, i32
  }
  func.func @transform_3(%arg0: i32, %arg1: i32) -> (i32, i32, i32) {
    %c0_i32 = arith.constant 0 : i32
    %c0_i32_0 = arith.constant 0 : i32
    return %arg0, %arg1, %c0_i32 : i32, i32, i32
  }
}

module attributes {stable_mosaic.version = 11 : i64} {
  func.func @_flash_kernel(%arg0: i32, %arg1: i32, %arg2: i32, %arg3: memref<1x128x128xbf16, #tpu.memory_space<vmem>>, %arg4: memref<1x128x128xbf16, #tpu.memory_space<vmem>>, %arg5: memref<1x128x128xbf16, #tpu.memory_space<vmem>>, %arg6: memref<64x128xbf16, #tpu.memory_space<vmem>>, %arg7: memref<64x1xf32, #tpu.memory_space<vmem>>, %arg8: memref<1x64x128xf32, #tpu.memory_space<vmem>>, %arg9: memref<1x1x2x64xf32, #tpu.memory_space<vmem>>, %arg10: memref<128x1xf32, #tpu.memory_space<vmem>>, %arg11: memref<128x1xf32, #tpu.memory_space<vmem>>, %arg12: memref<128x128xf32, #tpu.memory_space<vmem>>) attributes {dimension_semantics = [#tpu.dimension_semantics<parallel>, #tpu.dimension_semantics<parallel>, #tpu.dimension_semantics<arbitrary>], iteration_bounds = array<i64: 2, 2, 2>, scalar_prefetch = 0 : i64, scratch_operands = 3 : i64, tpu.core_type = #tpu.core_type<tc>, window_params = [{transform_indices = @transform_0, window_bounds = array<i64: 1, 128, 128>}, {transform_indices = @transform_1, window_bounds = array<i64: 1, 128, 128>}, {transform_indices = @transform_2, window_bounds = array<i64: 1, 128, 128>}, {pipeline_mode = #tpu.pipeline_mode<synchronous>, transform_indices = @transform_3, window_bounds = array<i64: 64, 128>}, {pipeline_mode = #tpu.pipeline_mode<synchronous>, transform_indices = @transform_4, window_bounds = array<i64: 64, 1>}, {transform_indices = @transform_5, window_bounds = array<i64: 1, 64, 128>}, {transform_indices = @transform_6, window_bounds = array<i64: 1, 1, 2, 64>}]} {
    %c0_i32 = arith.constant 0 : i32
    %0 = arith.cmpi eq, %arg2, %c0_i32 : i32
    %1 = arith.extui %0 : i1 to i32
    %c0_i32_0 = arith.constant 0 : i32
    %2 = arith.cmpi ne, %1, %c0_i32_0 : i32
    scf.if %2 {
      %cst_25 = arith.constant 0xFF800000 : f32
      %36 = vector.broadcast %cst_25 : f32 to vector<128x1xf32>
      %c0_26 = arith.constant 0 : index
      %c0_27 = arith.constant 0 : index
      %37 = vector.load %arg10[%c0_26, %c0_27] : memref<128x1xf32, #tpu.memory_space<vmem>>, vector<128x1xf32>
      tpu.vector_store %arg10[%c0_26, %c0_27], %36 {strides = array<i32>} : memref<128x1xf32, #tpu.memory_space<vmem>>, vector<128x1xf32>,
      %cst_28 = arith.constant 0.000000e+00 : f32
      %38 = vector.broadcast %cst_28 : f32 to vector<128x1xf32>
      %c0_29 = arith.constant 0 : index
      %c0_30 = arith.constant 0 : index
      %39 = vector.load %arg11[%c0_29, %c0_30] : memref<128x1xf32, #tpu.memory_space<vmem>>, vector<128x1xf32>
      tpu.vector_store %arg11[%c0_29, %c0_30], %38 {strides = array<i32>} : memref<128x1xf32, #tpu.memory_space<vmem>>, vector<128x1xf32>,
      %cst_31 = arith.constant 0.000000e+00 : f32
      %40 = vector.broadcast %cst_31 : f32 to vector<128x128xf32>
      %c0_32 = arith.constant 0 : index
      %c0_33 = arith.constant 0 : index
      %41 = vector.load %arg12[%c0_32, %c0_33] : memref<128x128xf32, #tpu.memory_space<vmem>>, vector<128x128xf32>
      tpu.vector_store %arg12[%c0_32, %c0_33], %40 {strides = array<i32>} : memref<128x128xf32, #tpu.memory_space<vmem>>, vector<128x128xf32>,
    } else {
    }
    %c0 = arith.constant 0 : index
    %c0_1 = arith.constant 0 : index
    %c0_2 = arith.constant 0 : index
    %3 = vector.load %arg3[%c0, %c0_1, %c0_2] : memref<1x128x128xbf16, #tpu.memory_space<vmem>>, vector<1x128x128xbf16>
    %4 = vector.shape_cast %3 : vector<1x128x128xbf16> to vector<128x128xbf16>
    %c0_3 = arith.constant 0 : index
    %c0_4 = arith.constant 0 : index
    %c0_5 = arith.constant 0 : index
    %5 = vector.load %arg4[%c0_3, %c0_4, %c0_5] : memref<1x128x128xbf16, #tpu.memory_space<vmem>>, vector<1x128x128xbf16>
    %6 = vector.shape_cast %5 : vector<1x128x128xbf16> to vector<128x128xbf16>
    %cst = arith.constant dense<0.000000e+00> : vector<128x128xf32>
    %7 = tpu.matmul %4, %6, %cst {dimension_numbers = #tpu.dot_dimension_numbers<[1], [1], [0], [0], [0, 0, 1, 0], [], []>} : vector<128x128xbf16>, vector<128x128xbf16>, vector<128x128xf32> -> vector<128x128xf32>
    %c0_6 = arith.constant 0 : index
    %c0_7 = arith.constant 0 : index
    %8 = vector.load %arg10[%c0_6, %c0_7] : memref<128x1xf32, #tpu.memory_space<vmem>>, vector<128x1xf32>
    %cst_8 = arith.constant dense<0xFF800000> : vector<128xf32>
    %9 = vector.multi_reduction <maximumf>, %7, %cst_8 [1] : vector<128x128xf32> to vector<128xf32>
    %10 = vector.shape_cast %9 : vector<128xf32> to vector<128x1xf32>
    %11 = arith.maximumf %8, %10 : vector<128x1xf32>
    %12 = arith.subf %8, %11 : vector<128x1xf32>
    %13 = math.exp %12 : vector<128x1xf32>
    %14 = vector.broadcast %11 : vector<128x1xf32> to vector<128x128xf32>
    %15 = arith.subf %7, %14 : vector<128x128xf32>
    %16 = math.exp %15 : vector<128x128xf32>
    %c0_9 = arith.constant 0 : index
    %c0_10 = arith.constant 0 : index
    %17 = vector.load %arg11[%c0_9, %c0_10] : memref<128x1xf32, #tpu.memory_space<vmem>>, vector<128x1xf32>
    %18 = arith.mulf %13, %17 : vector<128x1xf32>
    %cst_11 = arith.constant dense<0.000000e+00> : vector<128xf32>
    %19 = vector.multi_reduction <add>, %16, %cst_11 [1] : vector<128x128xf32> to vector<128xf32>
    %20 = vector.shape_cast %19 : vector<128xf32> to vector<128x1xf32>
    %21 = arith.addf %18, %20 : vector<128x1xf32>
    %c0_12 = arith.constant 0 : index
    %c0_13 = arith.constant 0 : index
    %22 = vector.load %arg11[%c0_12, %c0_13] : memref<128x1xf32, #tpu.memory_space<vmem>>, vector<128x1xf32>
    tpu.vector_store %arg11[%c0_12, %c0_13], %21 {strides = array<i32>} : memref<128x1xf32, #tpu.memory_space<vmem>>, vector<128x1xf32>,
    %c0_14 = arith.constant 0 : index
    %c0_15 = arith.constant 0 : index
    %23 = vector.load %arg12[%c0_14, %c0_15] : memref<128x128xf32, #tpu.memory_space<vmem>>, vector<128x128xf32>
    %24 = vector.broadcast %13 : vector<128x1xf32> to vector<128x128xf32>
    %25 = arith.mulf %24, %23 : vector<128x128xf32>
    %26 = arith.truncf %16 : vector<128x128xf32> to vector<128x128xbf16>
    %c0_16 = arith.constant 0 : index
    %c0_17 = arith.constant 0 : index
    %c0_18 = arith.constant 0 : index
    %27 = vector.load %arg5[%c0_16, %c0_17, %c0_18] : memref<1x128x128xbf16, #tpu.memory_space<vmem>>, vector<1x128x128xbf16>
    %28 = vector.shape_cast %27 : vector<1x128x128xbf16> to vector<128x128xbf16>
    %cst_19 = arith.constant dense<0.000000e+00> : vector<128x128xf32>
    %29 = tpu.matmul %26, %28, %cst_19 {dimension_numbers = #tpu.dot_dimension_numbers<[1], [0], [0], [1], [0, 0, 1, 1], [], []>} : vector<128x128xbf16>, vector<128x128xbf16>, vector<128x128xf32> -> vector<128x128xf32>
    %30 = arith.addf %25, %29 : vector<128x128xf32>
    %c0_20 = arith.constant 0 : index
    %c0_21 = arith.constant 0 : index
    %31 = vector.load %arg12[%c0_20, %c0_21] : memref<128x128xf32, #tpu.memory_space<vmem>>, vector<128x128xf32>
    tpu.vector_store %arg12[%c0_20, %c0_21], %30 {strides = array<i32>} : memref<128x128xf32, #tpu.memory_space<vmem>>, vector<128x128xf32>,
    %c0_22 = arith.constant 0 : index
    %c0_23 = arith.constant 0 : index
    %32 = vector.load %arg10[%c0_22, %c0_23] : memref<128x1xf32, #tpu.memory_space<vmem>>, vector<128x1xf32>
    tpu.vector_store %arg10[%c0_22, %c0_23], %11 {strides = array<i32>} : memref<128x1xf32, #tpu.memory_space<vmem>>, vector<128x1xf32>,
    %c1_i32 = arith.constant 1 : i32
    %33 = arith.cmpi eq, %arg2, %c1_i32 : i32
    %34 = arith.extui %33 : i1 to i32
    %c0_i32_24 = arith.constant 0 : i32
    %35 = arith.cmpi ne, %34, %c0_i32_24 : i32
    scf.if %35 {
      %c0_25 = arith.constant 0 : index
      %c0_26 = arith.constant 0 : index
      %36 = vector.load %arg12[%c0_25, %c0_26] : memref<128x128xf32, #tpu.memory_space<vmem>>, vector<128x128xf32>
      %c0_27 = arith.constant 0 : index
      %c0_28 = arith.constant 0 : index
      %37 = vector.load %arg11[%c0_27, %c0_28] : memref<128x1xf32, #tpu.memory_space<vmem>>, vector<128x1xf32>
      %38 = tpu.reciprocal %37 {approx = true} : vector<128x1xf32> -> vector<128x1xf32>
      %39 = vector.broadcast %38 : vector<128x1xf32> to vector<128x128xf32>
      %40 = arith.mulf %36, %39 : vector<128x128xf32>
      %c0_29 = arith.constant 0 : index
      %c0_30 = arith.constant 0 : index
      %41 = vector.load %arg6[%c0_29, %c0_30] : memref<64x128xbf16, #tpu.memory_space<vmem>>, vector<64x128xbf16>
      %42 = arith.truncf %40 : vector<128x128xf32> to vector<128x128xbf16>
      %cst_31 = arith.constant dense<0.000000e+00> : vector<64x128xf32>
      %43 = tpu.matmul %41, %42, %cst_31 {dimension_numbers = #tpu.dot_dimension_numbers<[1], [1], [0], [0], [0, 0, 1, 0], [], []>} : vector<64x128xbf16>, vector<128x128xbf16>, vector<64x128xf32> -> vector<64x128xf32>
      %c0_32 = arith.constant 0 : index
      %c0_33 = arith.constant 0 : index
      %44 = vector.load %arg7[%c0_32, %c0_33] : memref<64x1xf32, #tpu.memory_space<vmem>>, vector<64x1xf32>
      %45 = vector.broadcast %44 : vector<64x1xf32> to vector<64x128xf32>
      %46 = arith.addf %43, %45 : vector<64x128xf32>
      %c0_34 = arith.constant 0 : index
      %c0_35 = arith.constant 0 : index
      %c0_36 = arith.constant 0 : index
      %47 = vector.load %arg8[%c0_34, %c0_35, %c0_36] : memref<1x64x128xf32, #tpu.memory_space<vmem>>, vector<1x64x128xf32>
      %48 = vector.shape_cast %47 : vector<1x64x128xf32> to vector<64x128xf32>
      %49 = vector.shape_cast %46 : vector<64x128xf32> to vector<1x64x128xf32>
      tpu.vector_store %arg8[%c0_34, %c0_35, %c0_36], %49 {strides = array<i32>} : memref<1x64x128xf32, #tpu.memory_space<vmem>>, vector<1x64x128xf32>,
      %cst_37 = arith.constant dense<0.000000e+00> : vector<64xf32>
      %50 = vector.multi_reduction <add>, %46, %cst_37 [1] : vector<64x128xf32> to vector<64xf32>
      %c0_38 = arith.constant 0 : index
      %c0_39 = arith.constant 0 : index
      %c0_40 = arith.constant 0 : index
      %c0_41 = arith.constant 0 : index
      %51 = vector.load %arg9[%c0_38, %c0_39, %c0_40, %c0_41] : memref<1x1x2x64xf32, #tpu.memory_space<vmem>>, vector<1x1x1x64xf32>
      %52 = vector.shape_cast %51 : vector<1x1x1x64xf32> to vector<64xf32>
      %53 = vector.shape_cast %50 : vector<64xf32> to vector<1x1x1x64xf32>
      tpu.vector_store %arg9[%c0_38, %c0_39, %c0_40, %c0_41], %53 {strides = array<i32>} : memref<1x1x2x64xf32, #tpu.memory_space<vmem>>, vector<1x1x1x64xf32>,
      %54 = arith.mulf %46, %46 : vector<64x128xf32>
      %cst_42 = arith.constant dense<0.000000e+00> : vector<64xf32>
      %55 = vector.multi_reduction <add>, %54, %cst_42 [1] : vector<64x128xf32> to vector<64xf32>
      %c0_43 = arith.constant 0 : index
      %c0_44 = arith.constant 0 : index
      %c1 = arith.constant 1 : index
      %c0_45 = arith.constant 0 : index
      %56 = vector.load %arg9[%c0_43, %c0_44, %c1, %c0_45] : memref<1x1x2x64xf32, #tpu.memory_space<vmem>>, vector<1x1x1x64xf32>
      %57 = vector.shape_cast %56 : vector<1x1x1x64xf32> to vector<64xf32>
      %58 = vector.shape_cast %55 : vector<64xf32> to vector<1x1x1x64xf32>
      tpu.vector_store %arg9[%c0_43, %c0_44, %c1, %c0_45], %58 {strides = array<i32>} : memref<1x1x2x64xf32, #tpu.memory_space<vmem>>, vector<1x1x1x64xf32>,
    } else {
    }
    return
  }
  func.func @transform_0(%arg0: i32, %arg1: i32, %arg2: i32) -> (i32, i32, i32) {
    %c0_i32 = arith.constant 0 : i32
    %c0_i32_0 = arith.constant 0 : i32
    return %arg0, %arg1, %c0_i32 : i32, i32, i32
  }
  func.func @transform_1(%arg0: i32, %arg1: i32, %arg2: i32) -> (i32, i32, i32) {
    %c1_i32 = arith.constant 1 : i32
    %c0_i32 = arith.constant 0 : i32
    return %arg0, %arg2, %c1_i32 : i32, i32, i32
  }
  func.func @transform_2(%arg0: i32, %arg1: i32, %arg2: i32) -> (i32, i32, i32) {
    %c2_i32 = arith.constant 2 : i32
    %c0_i32 = arith.constant 0 : i32
    return %arg0, %arg2, %c2_i32 : i32, i32, i32
  }
  func.func @transform_3(%arg0: i32, %arg1: i32, %arg2: i32) -> (i32, i32) {
    %c0_i32 = arith.constant 0 : i32
    %c0_i32_0 = arith.constant 0 : i32
    %c0_i32_1 = arith.constant 0 : i32
    return %c0_i32, %c0_i32_0 : i32, i32
  }
  func.func @transform_4(%arg0: i32, %arg1: i32, %arg2: i32) -> (i32, i32) {
    %c0_i32 = arith.constant 0 : i32
    %c0_i32_0 = arith.constant 0 : i32
    %c0_i32_1 = arith.constant 0 : i32
    return %c0_i32, %c0_i32_0 : i32, i32
  }
  func.func @transform_5(%arg0: i32, %arg1: i32, %arg2: i32) -> (i32, i32, i32) {
    %c0_i32 = arith.constant 0 : i32
    %c0_i32_0 = arith.constant 0 : i32
    return %arg0, %c0_i32, %arg1 : i32, i32, i32
  }
  func.func @transform_6(%arg0: i32, %arg1: i32, %arg2: i32) -> (i32, i32, i32, i32) {
    %c0_i32 = arith.constant 0 : i32
    %c0_i32_0 = arith.constant 0 : i32
    %c0_i32_1 = arith.constant 0 : i32
    return %arg0, %arg1, %c0_i32, %c0_i32_0 : i32, i32, i32, i32
  }
}

</mosaic_0001>

<bundles_post_ra>
// kernel: nonlocal_forward.2
= control target key start
LH: loop header
LB: loop body
LE: loop exit
PB: predicated region body
PF: predicated region fallthrough
CT: control target
= control target key end

     0   :  { %s958_s12 = smov 0   ;;  %s960_s13 = smov 0   ;;  %s1263_s0 = inlined_call_operand.vmem [shape: f32[2,64,256], index: 0, kind: input, shape index: {}]   ;;  %s1264_s1 = inlined_call_operand.vmem [shape: bf16[64,384], index: 1, kind: input, shape index: {}]   ;;  %s1265_s2 = inlined_call_operand.vmem [shape: f32[1,384], index: 2, kind: input, shape index: {}]   ;;  %s1266_s3 = inlined_call_operand.vmem [shape: bf16[2,256,384], index: 3, kind: output, shape index: {}]  }
   0x1   :  { %s962_s14 = smov 0   ;;  %s964_s15 = smov 0  }
   0x2   :  { %s966_s16 = smov 0   ;;  %s968_s17 = smov 0  }
   0x3   :  { %s970_s18 = smov 0  }
   0x4 LB: > { %s22_s19 = sadd.s32 1, %s928_s16  ;;  %s25_s20 = sadd.s32 1, %s932_s17  ;;  %s936_s18 = sphi %s970_s18, %s13_s18   ;;  %s932_s17 = sphi %s968_s17, %s1272_s17   ;;  %s928_s16 = sphi %s966_s16, %s1271_s16   ;;  %s924_s15 = sphi %s964_s15, %s1270_s15   ;;  %s920_s14 = sphi %s962_s14, %s1269_s14   ;;  %s916_s13 = sphi %s960_s13, %s1268_s13   ;;  %s912_s12 = sphi %s958_s12, %s1267_s12  }
   0x5   : > { %p23_p0 = scmp.ge.s32.totalorder %s22_s19, 2  ;;  %p41_p1 = scmp.ne.s32.totalorder %s916_s13, %s912_s12 }
   0x6   : > { %p42_p2 = scmp.eq.s32.totalorder %s936_s18, 0  ;;  %s34_s24 = sadd.s32 1, %s916_s13 }
   0x7   : > { %s1274_s19 = smov (%p23_p0, %s22_s19), 0  ;;  %s1276_s20 = smov (!%p23_p0, %s25_s20), %s932_s17 }
   0x8   : > { %p43_p3 = por %p42_p2, %p41_p1  ;;  %p27_p4 = scmp.ge.s32.totalorder %s1276_s20, 2 }
   0x9   : > { %s30_s21 = ssub.s32 %s928_s16, %s1274_s19  ;;  %p717_p6 = scmp.ge.s32.totalorder %s936_s18, 4 }
   0xa   : > { %s1278_s20 = smov (%p27_p4, %s1276_s20), 0 }
   0xb   : > { %s29_s22 = ssub.s32 %s932_s17, %s1278_s20  ;;  %143 = sbr.rel (%p717_p6) target bundleno = 30 (0x1e), region = 24 }
   0xc   : > { %s31_s23 = sor.u32 %s30_s21, %s29_s22 }
   0xd   : > { %p32_p5 = scmp.eq.s32.totalorder %s31_s23, 0 }
   0xf   : > { %s1009_s25 = scalar_select %p32_p5, %s916_s13, %s34_s24  }
  0x10   : > { %146 = sbr.rel (!%p43_p3) target bundleno = 30 (0x1e), region = 28  ;;  %s148_s26 = sand.u32 (%p43_p3), 1, %s916_s13  }
  0x11   : > { %s719_s27 = sshll.u32 (%p43_p3), %s932_s17, 4  ;;  %s718_s28 = sshll.u32 (%p43_p3), %s148_s26, 6 }
  0x12   : > { %s152_s29 = sadd.s32 (%p43_p3), %s928_s16, %s719_s27  ;;  %s150_s7 = scalar_lea.vmem (%p43_p3), [#allocation2], %s718_s28 }
  0x13   : > { %s720_s30 = sshll.u32 (%p43_p3), %s152_s29, 3 }
  0x14   : > { %s154_s6 = scalar_lea.vmem (%p43_p3), %s1263_s0, %s720_s30 }
  0x15   : > { %v197_v0 = vld [vmem:[%s154_s6] sm:$0xff]  ;;  %v199_v1 = vld [vmem:[%s154_s6 + $0x10] sm:$0xff] }
  0x16   : > { %v201_v2 = vld [vmem:[%s154_s6 + $0x20] sm:$0xff]  ;;  %198 = vst [vmem:[%s150_s7] sm:$0xff] %v197_v0  ;;  %v203_v3 = vld [vmem:[%s154_s6 + $0x30] sm:$0xff] }
  0x17   : > { %200 = vst [vmem:[%s150_s7 + $0x8] sm:$0xff] %v199_v1  ;;  %v205_v4 = vld [vmem:[%s154_s6 + $0x40] sm:$0xff]  ;;  %v207_v5 = vld [vmem:[%s154_s6 + $0x50] sm:$0xff] }
  0x18   : > { %202 = vst [vmem:[%s150_s7 + $0x10] sm:$0xff] %v201_v2  ;;  %v209_v6 = vld [vmem:[%s154_s6 + $0x60] sm:$0xff]  ;;  %v211_v7 = vld [vmem:[%s154_s6 + $0x70] sm:$0xff] }
  0x19   : > { %204 = vst [vmem:[%s150_s7 + $0x18] sm:$0xff] %v203_v3 }
  0x1a   : > { %206 = vst [vmem:[%s150_s7 + $0x20] sm:$0xff] %v205_v4 }
  0x1b   : > { %208 = vst [vmem:[%s150_s7 + $0x28] sm:$0xff] %v207_v5 }
  0x1c   : > { %210 = vst [vmem:[%s150_s7 + $0x30] sm:$0xff] %v209_v6 }
  0x1d   : > { %212 = vst [vmem:[%s150_s7 + $0x38] sm:$0xff] %v211_v7 }
  0x1e PF: > { %p721_p7 = scmp.ge.s32.totalorder %s936_s18, 1  ;;  %p217_p8 = scmp.lt.s32.totalorder %s936_s18, 5 }
  0x20   : > { %p218_p9 = pnand %p721_p7, %p217_p8 }
  0x21   : > { %s224_s8 = sand.u32 (!%p218_p9), 1, %s912_s12   ;;  %p253_p10 = scmp.lt.s32.totalorder (!%p218_p9), %s924_s15, 1 }
  0x22   : > { %221 = sbr.rel (%p218_p9) target bundleno = 536 (0x218), region = 66  ;;  %s722_s9 = sshll.u32 (!%p218_p9), %s224_s8, 6 }
  0x23   : > { %s1021_s10 = scalar_lea.vmem (!%p218_p9), [#allocation2], %s722_s9 }
  0x27   : > { %v264_v8 = vld [vmem:[%s1021_s10] sm:$0xff]  ;;  %v265_v9 = vld [vmem:[%s1021_s10 + $0x8] sm:$0xff]  ;;  %v266_v11 = vld [vmem:[%s1021_s10 + $0x10] sm:$0xff]  ;;  %vm380_vm0 = vcmask 523264   ;;  %s1280_s15 = smov (!%p253_p10, %s924_s15), 1 }
  0x28   : > { %v272_v10 = vpack.c.bf16 %v265_v9, %v264_v8  ;;  %v267_v12 = vld [vmem:[%s1021_s10 + $0x18] sm:$0xff]  ;;  %v763_v14 = vld [vmem:[%s1264_s1 + $0x48] sm:$0xf]  ;;  %v809_v15 = vld [vmem:[%s1264_s1 + $0x50] sm:$0xf0]  ;;  %s824_s7 = smul.u32 96, %s1280_s15 }
  0x29   : > { %v273_v13 = vpack.c.bf16 %v267_v12, %v266_v11  ;;  %v808_v16 = vld [vmem:[%s1264_s1 + $0x4c] sm:$0xf]  ;;  %v764_v17 = vor.u32 %v809_v15, %v763_v14  ;;  %v765_v18 = vld [vmem:[%s1264_s1 + $0x54] sm:$0xf0]  ;;  %v771_v19 = vld [vmem:[%s1264_s1 + $0x50] sm:$0xf] }
  0x2a   : > { %300 = vxpose.xlu0.c.b16.start [1/4] (short) %v272_v10, 128  ;;  %v810_v20 = vld [vmem:[%s1264_s1 + $0x58] sm:$0xf0]  ;;  %v768_v21 = vor.u32 %v808_v16, %v765_v18  ;;  %v751_v23 = vld [vmem:[%s1264_s1 + $0x30] sm:$0xf]  ;;  %v805_v25 = vld [vmem:[%s1264_s1 + $0x34] sm:$0xf] }
  0x2b   : > { %v1045_v22 = vor.u32 %v810_v20, %v771_v19  ;;  %v806_v24 = vld [vmem:[%s1264_s1 + $0x38] sm:$0xf0]  ;;  %409 = vmatpush.bf16.msra.mxu0 %v764_v17  ;;  %v753_v27 = vld [vmem:[%s1264_s1 + $0x3c] sm:$0xf0]  ;;  %v759_v28 = vld [vmem:[%s1264_s1 + $0x38] sm:$0xf]  ;;  %811 = vmatpush.bf16.msra.mxu3 %v764_v17 }
  0x2c   : > { %v752_v26 = vor.u32 %v806_v24, %v751_v23  ;;  %v807_v29 = vld [vmem:[%s1264_s1 + $0x40] sm:$0xf0]  ;;  %458 = vmatpush.bf16.msra.mxu1 %v768_v21  ;;  %v756_v30 = vor.u32 %v805_v25, %v753_v27  ;;  %v739_v32 = vld [vmem:[%s1264_s1 + $0x18] sm:$0xf]  ;;  %v802_v34 = vld [vmem:[%s1264_s1 + $0x1c] sm:$0xf] }
  0x2d   : > { %507 = vmatpush.bf16.msra.mxu2 %v1045_v22  ;;  %v1066_v31 = vor.u32 %v807_v29, %v759_v28  ;;  %v803_v33 = vld [vmem:[%s1264_s1 + $0x20] sm:$0xf0]  ;;  %v741_v35 = vld [vmem:[%s1264_s1 + $0x24] sm:$0xf0]  ;;  %v747_v36 = vld [vmem:[%s1264_s1 + $0x20] sm:$0xf] }
  0x2e   : > { %v804_v37 = vld [vmem:[%s1264_s1 + $0x28] sm:$0xf0]  ;;  %v740_v38 = vor.u32 %v803_v33, %v739_v32  ;;  %v268_v39 = vld [vmem:[%s1021_s10 + $0x20] sm:$0xff]  ;;  %v744_v40 = vor.u32 %v802_v34, %v741_v35  ;;  %v729_v46 = vld [vmem:[%s1264_s1 + $0xc] sm:$0xf0] }
  0x2f   : > { %410 = vmatpush.bf16.msra.mxu0 %v752_v26  ;;  %812 = vmatpush.bf16.msra.mxu3 %v752_v26  ;;  %v748_v41 = vor.u32 %v804_v37, %v747_v36  ;;  %v727_v42 = vld [vmem:[%s1264_s1] sm:$0xf]  ;;  %v800_v43 = vld [vmem:[%s1264_s1 + $0x8] sm:$0xf0]  ;;  %v799_v45 = vld [vmem:[%s1264_s1 + $0x4] sm:$0xf] }
  0x30   : > { %459 = vmatpush.bf16.msra.mxu1 %v756_v30  ;;  %v269_v44 = vld [vmem:[%s1021_s10 + $0x28] sm:$0xff]  ;;  %v801_v48 = vld [vmem:[%s1264_s1 + $0x10] sm:$0xf0]  ;;  %v728_v49 = vor.u32 %v800_v43, %v727_v42  ;;  %v732_v51 = vor.u32 %v799_v45, %v729_v46  ;;  %v271_v54 = vld [vmem:[%s1021_s10 + $0x38] sm:$0xff] }
  0x31   : > { %508 = vmatpush.bf16.msra.mxu2 %v1066_v31  ;;  %v735_v47 = vld [vmem:[%s1264_s1 + $0x8] sm:$0xf]  ;;  %v274_v50 = vpack.c.bf16 %v269_v44, %v268_v39  ;;  %v270_v53 = vld [vmem:[%s1021_s10 + $0x30] sm:$0xff]  ;;  %s723_s10 = sshll.u32 %s920_s14, 4  ;;  %v292_v0 = vld [vmem:[%s1265_s2] sm:$0x7] }
  0x32   : > { %v736_v52 = vor.u32 %v801_v48, %v735_v47  ;;  %v275_v55 = vpack.c.bf16 %v271_v54, %v270_v53  ;;  %p255_p11 = scmp.lt.s32.totalorder %s723_s10, 31  ;;  %v1143_v1 = vperm.slane %v292_v0, 0  ;;  %v1145_v2 = vperm.slane %v292_v0, 1 }
  0x33   : > { %411 = vmatpush.bf16.msra.mxu0 %v740_v38  ;;  %813 = vmatpush.bf16.msra.mxu3 %v740_v38  ;;  %v1156_v8 = vperm.slane %v292_v0, 2 }
  0x34   : > { %460 = vmatpush.bf16.msra.mxu1 %v744_v40  ;;  %s1282_s10 = smov (!%p255_p11, %s723_s10), 31 }
  0x35   : > { %509 = vmatpush.bf16.msra.mxu2 %v748_v41  ;;  %s823_s8 = smul.u32 3, %s1282_s10 }
  0x37   : > { %412 = vmatpush.bf16.msra.mxu0 %v728_v49  ;;  %814 = vmatpush.bf16.msra.mxu3 %v728_v49  ;;  %s259_s21 = sadd.s32 %s824_s7, %s823_s8 }
  0x38   : > { %461 = vmatpush.bf16.msra.mxu1 %v732_v51  ;;  %s724_s14 = sshll.u32 %s259_s21, 2 }
  0x39   : > { %510 = vmatpush.bf16.msra.mxu2 %v736_v52  ;;  %s1152_s15 = scalar_lea.vmem %s1266_s3, %s724_s14 }
  0x3a   : > { %301 = vxpose.xlu0.c.b16.cont [2/4] (short) %v273_v13, 128 }
  0x3b   : > { %815 = vmatpush.bf16.msrb.mxu3 %v768_v21 }
  0x3f   : > { %816 = vmatpush.bf16.msrb.mxu3 %v756_v30 }
  0x43   : > { %817 = vmatpush.bf16.msrb.mxu3 %v744_v40 }
  0x47   : > { %818 = vmatpush.bf16.msrb.mxu3 %v732_v51 }
  0x4a   : > { %302 = vxpose.xlu0.c.b16.cont [3/4] (short) %v274_v50, 128 }
  0x5a   : > { %303 = vxpose.xlu0.c.b16.end [4/4] (short) %v275_v55, 128 }
  0xd6   : > { %v308_v56 = vpop.trf.xlu0 }
  0xd7   : > { %773 = vmatmul.msk.bf16.vlgmr.msra.gmra.mxu0 %vm380_vm0, %v308_v56  ;;  %781 = vmatmul.msk.bf16.vlgmr.msra.gmra.mxu1 %vm380_vm0, %v308_v56 }
  0xd8   : > { %789 = vmatmul.msk.bf16.vlgmr.msra.gmra.mxu2 %vm380_vm0, %v308_v56 }
  0xe6   : > { %v309_v57 = vpop.trf.xlu0 }
  0xe7   : > { %774 = vmatmul.msk.bf16.gmra.mxu0 %vm380_vm0, %v309_v57  ;;  %782 = vmatmul.msk.bf16.gmra.mxu1 %vm380_vm0, %v309_v57 }
  0xe8   : > { %790 = vmatmul.msk.bf16.gmra.mxu2 %vm380_vm0, %v309_v57 }
  0xf6   : > { %v310_v58 = vpop.trf.xlu0 }
  0xf7   : > { %775 = vmatmul.msk.bf16.gmra.mxu0 %vm380_vm0, %v310_v58  ;;  %783 = vmatmul.msk.bf16.gmra.mxu1 %vm380_vm0, %v310_v58 }
  0xf8   : > { %791 = vmatmul.msk.bf16.gmra.mxu2 %vm380_vm0, %v310_v58 }
 0x106   : > { %v311_v59 = vpop.trf.xlu0 }
 0x107   : > { %776 = vmatmul.msk.bf16.gmra.mxu0 %vm380_vm0, %v311_v59  ;;  %784 = vmatmul.msk.bf16.gmra.mxu1 %vm380_vm0, %v311_v59 }
 0x108   : > { %792 = vmatmul.msk.bf16.gmra.mxu2 %vm380_vm0, %v311_v59 }
 0x116   : > { %v312_v60 = vpop.trf.xlu0 }
 0x117   : > { %777 = vmatmul.msk.bf16.gmra.mxu0 %vm380_vm0, %v312_v60  ;;  %785 = vmatmul.msk.bf16.gmra.mxu1 %vm380_vm0, %v312_v60 }
 0x118   : > { %793 = vmatmul.msk.bf16.gmra.mxu2 %vm380_vm0, %v312_v60 }
 0x126   : > { %v313_v61 = vpop.trf.xlu0 }
 0x127   : > { %778 = vmatmul.msk.bf16.gmra.mxu0 %vm380_vm0, %v313_v61  ;;  %786 = vmatmul.msk.bf16.gmra.mxu1 %vm380_vm0, %v313_v61 }
 0x128   : > { %794 = vmatmul.msk.bf16.gmra.mxu2 %vm380_vm0, %v313_v61 }
 0x136   : > { %v1127_v62 = vpop.trf.xlu0 }
 0x137   : > { %779 = vmatmul.msk.bf16.vlgmr.msra.gmra.mxu3 %vm380_vm0, %v1127_v62 }
 0x138   : > { %819 = vmatpush.bf16.msra.mxu3 %v1045_v22 }
 0x13c   : > { %820 = vmatpush.bf16.msra.mxu3 %v1066_v31 }
 0x140   : > { %821 = vmatpush.bf16.msra.mxu3 %v748_v41 }
 0x144   : > { %822 = vmatpush.bf16.msra.mxu3 %v736_v52 }
 0x146   : > { %v1135_v63 = vpop.trf.xlu0 }
 0x147   : > { %780 = vmatmul.msk.bf16.gmra.mxu3 %vm380_vm0, %v1135_v63 }
 0x154   : > { %v414_v3 = vpop.f32.mrf.mxu0  ;;  %v463_v4 = vpop.f32.mrf.mxu1 }
 0x155   : > { %v415_v5 = vadd.f32 %v414_v3, %v1143_v1  ;;  %v464_v6 = vadd.f32 %v463_v4, %v1145_v2 }
 0x157   : > { %v552_v7 = vpack.c.bf16 %v464_v6, %v415_v5  ;;  %787 = vmatmul.msk.bf16.vlgmr.msrb.gmra.mxu3 %vm380_vm0, %v1127_v62 }
 0x159   : > { %584 = vst [vmem:[%s1152_s15] sm:$0xff] %v552_v7 }
 0x15b   : > { %v512_v9 = vpop.f32.mrf.mxu2 }
 0x15c   : > { %v513_v10 = vadd.f32 %v512_v9, %v1156_v8  ;;  %v416_v11 = vpop.f32.mrf.mxu0  ;;  %v465_v12 = vpop.f32.mrf.mxu1 }
 0x15d   : > { %v417_v13 = vadd.f32 %v416_v11, %v1143_v1  ;;  %v466_v14 = vadd.f32 %v465_v12, %v1145_v2 }
 0x15e   : > { %v553_v15 = vpack.c.bf16 %v513_v10, %v513_v10 }
 0x15f   : > { %v554_v16 = vpack.c.bf16 %v466_v14, %v417_v13 }
 0x160   : > { %585 = vst [vmem:[%s1152_s15 + $0x8] sm:$0xf] %v553_v15 }
 0x161   : > { %586 = vst [vmem:[%s1152_s15 + $0xc] sm:$0xff] %v554_v16 }
 0x163   : > { %v514_v17 = vpop.f32.mrf.mxu2 }
 0x164   : > { %v515_v18 = vadd.f32 %v514_v17, %v1156_v8  ;;  %v419_v19 = vpop.f32.mrf.mxu0  ;;  %v468_v20 = vpop.f32.mrf.mxu1 }
 0x165   : > { %v420_v21 = vadd.f32 %v419_v19, %v1143_v1  ;;  %v469_v22 = vadd.f32 %v468_v20, %v1145_v2 }
 0x166   : > { %v555_v23 = vpack.c.bf16 %v515_v18, %v515_v18 }
 0x167   : > { %v556_v24 = vpack.c.bf16 %v469_v22, %v420_v21  ;;  %788 = vmatmul.msk.bf16.gmra.mxu3 %vm380_vm0, %v1135_v63 }
 0x168   : > { %587 = vst [vmem:[%s1152_s15 + $0x14] sm:$0xf] %v555_v23 }
 0x169   : > { %588 = vst [vmem:[%s1152_s15 + $0x18] sm:$0xff] %v556_v24 }
 0x16b   : > { %v517_v25 = vpop.f32.mrf.mxu2 }
 0x16c   : > { %v518_v26 = vadd.f32 %v517_v25, %v1156_v8  ;;  %v421_v27 = vpop.f32.mrf.mxu0  ;;  %v470_v28 = vpop.f32.mrf.mxu1 }
 0x16d   : > { %v422_v29 = vadd.f32 %v421_v27, %v1143_v1  ;;  %v471_v30 = vadd.f32 %v470_v28, %v1145_v2 }
 0x16e   : > { %v557_v31 = vpack.c.bf16 %v518_v26, %v518_v26 }
 0x16f   : > { %v558_v32 = vpack.c.bf16 %v471_v30, %v422_v29 }
 0x170   : > { %589 = vst [vmem:[%s1152_s15 + $0x20] sm:$0xf] %v557_v31 }
 0x171   : > { %590 = vst [vmem:[%s1152_s15 + $0x24] sm:$0xff] %v558_v32 }
 0x173   : > { %v519_v33 = vpop.f32.mrf.mxu2 }
 0x174   : > { %v520_v34 = vadd.f32 %v519_v33, %v1156_v8  ;;  %v424_v35 = vpop.f32.mrf.mxu0  ;;  %v473_v36 = vpop.f32.mrf.mxu1 }
 0x175   : > { %v425_v37 = vadd.f32 %v424_v35, %v1143_v1  ;;  %v474_v38 = vadd.f32 %v473_v36, %v1145_v2 }
 0x176   : > { %v559_v39 = vpack.c.bf16 %v520_v34, %v520_v34 }
 0x177   : > { %v560_v40 = vpack.c.bf16 %v474_v38, %v425_v37  ;;  %795 = vmatmul.msk.bf16.vlgmr.msra.gmra.mxu3 %vm380_vm0, %v1127_v62 }
 0x178   : > { %591 = vst [vmem:[%s1152_s15 + $0x2c] sm:$0xf] %v559_v39 }
 0x179   : > { %592 = vst [vmem:[%s1152_s15 + $0x30] sm:$0xff] %v560_v40 }
 0x17b   : > { %v522_v41 = vpop.f32.mrf.mxu2 }
 0x17c   : > { %v523_v42 = vadd.f32 %v522_v41, %v1156_v8  ;;  %v426_v43 = vpop.f32.mrf.mxu0  ;;  %v475_v44 = vpop.f32.mrf.mxu1 }
 0x17d   : > { %v427_v45 = vadd.f32 %v426_v43, %v1143_v1  ;;  %v476_v46 = vadd.f32 %v475_v44, %v1145_v2 }
 0x17e   : > { %v561_v47 = vpack.c.bf16 %v523_v42, %v523_v42 }
 0x17f   : > { %v562_v48 = vpack.c.bf16 %v476_v46, %v427_v45 }
 0x180   : > { %593 = vst [vmem:[%s1152_s15 + $0x38] sm:$0xf] %v561_v47 }
 0x181   : > { %594 = vst [vmem:[%s1152_s15 + $0x3c] sm:$0xff] %v562_v48 }
 0x183   : > { %v524_v49 = vpop.f32.mrf.mxu2 }
 0x184   : > { %v525_v50 = vadd.f32 %v524_v49, %v1156_v8  ;;  %v429_v51 = vpop.f32.mrf.mxu0  ;;  %v478_v52 = vpop.f32.mrf.mxu1 }
 0x185   : > { %v430_v53 = vadd.f32 %v429_v51, %v1143_v1  ;;  %v479_v54 = vadd.f32 %v478_v52, %v1145_v2 }
 0x186   : > { %v563_v55 = vpack.c.bf16 %v525_v50, %v525_v50 }
 0x187   : > { %v564_v56 = vpack.c.bf16 %v479_v54, %v430_v53  ;;  %796 = vmatmul.msk.bf16.gmra.mxu3 %vm380_vm0, %v1135_v63 }
 0x188   : > { %595 = vst [vmem:[%s1152_s15 + $0x44] sm:$0xf] %v563_v55 }
 0x189   : > { %596 = vst [vmem:[%s1152_s15 + $0x48] sm:$0xff] %v564_v56 }
 0x18b   : > { %v527_v57 = vpop.f32.mrf.mxu2 }
 0x18c   : > { %v528_v58 = vadd.f32 %v527_v57, %v1156_v8  ;;  %v431_v59 = vpop.f32.mrf.mxu0  ;;  %v480_v60 = vpop.f32.mrf.mxu1 }
 0x18d   : > { %v432_v61 = vadd.f32 %v431_v59, %v1143_v1  ;;  %v481_v62 = vadd.f32 %v480_v60, %v1145_v2 }
 0x18e   : > { %v565_v0 = vpack.c.bf16 %v528_v58, %v528_v58 }
 0x18f   : > { %v566_v3 = vpack.c.bf16 %v481_v62, %v432_v61 }
 0x190   : > { %597 = vst [vmem:[%s1152_s15 + $0x50] sm:$0xf] %v565_v0 }
 0x191   : > { %598 = vst [vmem:[%s1152_s15 + $0x54] sm:$0xff] %v566_v3 }
 0x193   : > { %v529_v4 = vpop.f32.mrf.mxu2 }
 0x194   : > { %v530_v63 = vadd.f32 %v529_v4, %v1156_v8  ;;  %v434_v5 = vpop.f32.mrf.mxu0  ;;  %v483_v6 = vpop.f32.mrf.mxu1 }
 0x195   : > { %v435_v7 = vadd.f32 %v434_v5, %v1143_v1  ;;  %v484_v9 = vadd.f32 %v483_v6, %v1145_v2 }
 0x196   : > { %v567_v10 = vpack.c.bf16 %v530_v63, %v530_v63 }
 0x197   : > { %v568_v11 = vpack.c.bf16 %v484_v9, %v435_v7 }
 0x198   : > { %599 = vst [vmem:[%s1152_s15 + $0x5c] sm:$0xf] %v567_v10 }
 0x199   : > { %600 = vst [vmem:[%s1152_s15 + $0x60] sm:$0xff] %v568_v11 }
 0x19b   : > { %v532_v12 = vpop.f32.mrf.mxu2 }
 0x19c   : > { %v533_v13 = vadd.f32 %v532_v12, %v1156_v8  ;;  %v436_v14 = vpop.f32.mrf.mxu0  ;;  %v485_v15 = vpop.f32.mrf.mxu1 }
 0x19d   : > { %v437_v16 = vadd.f32 %v436_v14, %v1143_v1  ;;  %v486_v17 = vadd.f32 %v485_v15, %v1145_v2 }
 0x19e   : > { %v569_v18 = vpack.c.bf16 %v533_v13, %v533_v13 }
 0x19f   : > { %v570_v19 = vpack.c.bf16 %v486_v17, %v437_v16 }
 0x1a0   : > { %601 = vst [vmem:[%s1152_s15 + $0x68] sm:$0xf] %v569_v18 }
 0x1a1   : > { %602 = vst [vmem:[%s1152_s15 + $0x6c] sm:$0xff] %v570_v19 }
 0x1a3   : > { %v534_v20 = vpop.f32.mrf.mxu2 }
 0x1a4   : > { %v535_v21 = vadd.f32 %v534_v20, %v1156_v8  ;;  %v439_v22 = vpop.f32.mrf.mxu0  ;;  %v488_v23 = vpop.f32.mrf.mxu1 }
 0x1a5   : > { %v440_v24 = vadd.f32 %v439_v22, %v1143_v1  ;;  %v489_v25 = vadd.f32 %v488_v23, %v1145_v2 }
 0x1a6   : > { %v571_v26 = vpack.c.bf16 %v535_v21, %v535_v21 }
 0x1a7   : > { %v572_v27 = vpack.c.bf16 %v489_v25, %v440_v24 }
 0x1a8   : > { %603 = vst [vmem:[%s1152_s15 + $0x74] sm:$0xf] %v571_v26 }
 0x1a9   : > { %604 = vst [vmem:[%s1152_s15 + $0x78] sm:$0xff] %v572_v27 }
 0x1ab   : > { %v537_v28 = vpop.f32.mrf.mxu2 }
 0x1ac   : > { %v538_v29 = vadd.f32 %v537_v28, %v1156_v8  ;;  %v441_v30 = vpop.f32.mrf.mxu0  ;;  %v490_v31 = vpop.f32.mrf.mxu1 }
 0x1ad   : > { %v442_v32 = vadd.f32 %v441_v30, %v1143_v1  ;;  %v491_v33 = vadd.f32 %v490_v31, %v1145_v2 }
 0x1ae   : > { %v573_v34 = vpack.c.bf16 %v538_v29, %v538_v29 }
 0x1af   : > { %v574_v35 = vpack.c.bf16 %v491_v33, %v442_v32 }
 0x1b0   : > { %605 = vst [vmem:[%s1152_s15 + $0x80] sm:$0xf] %v573_v34 }
 0x1b1   : > { %606 = vst [vmem:[%s1152_s15 + $0x84] sm:$0xff] %v574_v35 }
 0x1b3   : > { %v539_v36 = vpop.f32.mrf.mxu2 }
 0x1b4   : > { %v540_v37 = vadd.f32 %v539_v36, %v1156_v8 }
 0x1b6   : > { %v575_v38 = vpack.c.bf16 %v540_v37, %v540_v37 }
 0x1b8   : > { %607 = vst [vmem:[%s1152_s15 + $0x8c] sm:$0xf] %v575_v38 }
 0x1ba   : > { %v444_v39 = vpop.f32.mrf.mxu3 }
 0x1bb   : > { %v445_v44 = vadd.f32 %v444_v39, %v1143_v1 }
 0x1c2   : > { %v446_v40 = vpop.f32.mrf.mxu3 }
 0x1c3   : > { %v447_v48 = vadd.f32 %v446_v40, %v1143_v1 }
 0x1ca   : > { %v449_v41 = vpop.f32.mrf.mxu3 }
 0x1cb   : > { %v450_v52 = vadd.f32 %v449_v41, %v1143_v1 }
 0x1d2   : > { %v451_v42 = vpop.f32.mrf.mxu3 }
 0x1d3   : > { %v452_v56 = vadd.f32 %v451_v42, %v1143_v1 }
 0x1da   : > { %v493_v43 = vpop.f32.mrf.mxu3 }
 0x1db   : > { %v494_v45 = vadd.f32 %v493_v43, %v1145_v2 }
 0x1dd   : > { %v576_v46 = vpack.c.bf16 %v494_v45, %v445_v44 }
 0x1df   : > { %608 = vst [vmem:[%s1152_s15 + $0x90] sm:$0xff] %v576_v46 }
 0x1e2   : > { %v495_v47 = vpop.f32.mrf.mxu3 }
 0x1e3   : > { %v496_v49 = vadd.f32 %v495_v47, %v1145_v2 }
 0x1e5   : > { %v578_v50 = vpack.c.bf16 %v496_v49, %v447_v48 }
 0x1e7   : > { %610 = vst [vmem:[%s1152_s15 + $0x9c] sm:$0xff] %v578_v50 }
 0x1ea   : > { %v498_v51 = vpop.f32.mrf.mxu3 }
 0x1eb   : > { %v499_v53 = vadd.f32 %v498_v51, %v1145_v2 }
 0x1ed   : > { %v580_v54 = vpack.c.bf16 %v499_v53, %v450_v52 }
 0x1ef   : > { %612 = vst [vmem:[%s1152_s15 + $0xa8] sm:$0xff] %v580_v54 }
 0x1f2   : > { %v500_v55 = vpop.f32.mrf.mxu3 }
 0x1f3   : > { %v501_v57 = vadd.f32 %v500_v55, %v1145_v2 }
 0x1f5   : > { %v582_v58 = vpack.c.bf16 %v501_v57, %v452_v56 }
 0x1f7   : > { %614 = vst [vmem:[%s1152_s15 + $0xb4] sm:$0xff] %v582_v58 }
 0x1fa   : > { %v542_v59 = vpop.f32.mrf.mxu3 }
 0x1fb   : > { %v543_v60 = vadd.f32 %v542_v59, %v1156_v8 }
 0x1fd   : > { %v577_v61 = vpack.c.bf16 %v543_v60, %v543_v60 }
 0x1ff   : > { %609 = vst [vmem:[%s1152_s15 + $0x98] sm:$0xf] %v577_v61 }
 0x202   : > { %v544_v62 = vpop.f32.mrf.mxu3 }
 0x203   : > { %v545_v0 = vadd.f32 %v544_v62, %v1156_v8 }
 0x205   : > { %v579_v3 = vpack.c.bf16 %v545_v0, %v545_v0 }
 0x207   : > { %611 = vst [vmem:[%s1152_s15 + $0xa4] sm:$0xf] %v579_v3 }
 0x20a   : > { %v547_v4 = vpop.f32.mrf.mxu3 }
 0x20b   : > { %v548_v63 = vadd.f32 %v547_v4, %v1156_v8 }
 0x20d   : > { %v581_v5 = vpack.c.bf16 %v548_v63, %v548_v63 }
 0x20f   : > { %613 = vst [vmem:[%s1152_s15 + $0xb0] sm:$0xf] %v581_v5 }
 0x212   : > { %v549_v1 = vpop.f32.mrf.mxu3 }
 0x213   : > { %v550_v2 = vadd.f32 %v549_v1, %v1156_v8 }
 0x215   : > { %v583_v6 = vpack.c.bf16 %v550_v2, %v550_v2 }
 0x217   : > { %615 = vst [vmem:[%s1152_s15 + $0xbc] sm:$0xf] %v583_v6 }
 0x218 PF: > { %s13_s18 = sadd.s32 1, %s936_s18   ;;  %s1267_s12 = smov %s916_s13 }
 0x219   : > { %p10_p12 = scmp.ge.s32.totalorder %s13_s18, 6   ;;  %s1268_s13 = smov %s1009_s25 }
 0x21a   : > { %s1269_s14 = smov %s928_s16  ;;  %s1270_s15 = smov %s932_s17 }
 0x21b   : > { %s1271_s16 = smov %s1274_s19  ;;  %s1272_s17 = smov %s1278_s20 }
 0x21c   :  { %12 = sbr.rel (!%p10_p12) target bundleno = 4 (0x4), region = 105 }

// kernel: nonlocal_forward.3
= control target key start
LH: loop header
LB: loop body
LE: loop exit
PB: predicated region body
PF: predicated region fallthrough
CT: control target
= control target key end

     0   :  { %s3398_s0 = inlined_call_operand.vmem [shape: bf16[2,256,384], index: 0, kind: input, shape index: {}, may-alias: {0,1,2}]   ;;  %s3399_s1 = inlined_call_operand.vmem [shape: bf16[2,256,384], index: 1, kind: input, shape index: {}, may-alias: {0,1,2}]   ;;  %s3400_s2 = inlined_call_operand.vmem [shape: bf16[2,256,384], index: 2, kind: input, shape index: {}, may-alias: {0,1,2}]   ;;  %s3401_s3 = inlined_call_operand.vmem [shape: bf16[64,128], index: 3, kind: input, shape index: {}]   ;;  %s3402_s4 = inlined_call_operand.vmem [shape: f32[64,1], index: 4, kind: input, shape index: {}]   ;;  %s3403_s5 = inlined_call_operand.vmem [shape: f32[2,64,256], index: 5, kind: output, shape index: {0}]   ;;  %s3404_s6 = inlined_call_operand.vmem [shape: f32[2,2,2,64], index: 6, kind: output, shape index: {1}]  }
   0x1   :  { %3409 = sst [smem:[#allocation13_spill]] %s3398_s0 }
   0x2   :  { %3410 = sst [smem:[#allocation14_spill]] %s3399_s1 }
   0x3   :  { %3411 = sst [smem:[#allocation15_spill]] %s3403_s5 }
   0x4   :  { %s2691_s21 = smov 0   ;;  %s2693_s22 = smov 0  }
   0x5   :  { %s2695_s23 = smov 0   ;;  %s2697_s24 = smov 0  }
   0x6   :  { %s2699_s25 = smov 0   ;;  %s2701_s26 = smov 0  }
   0x7   :  { %s2703_s27 = smov 0   ;;  %s2705_s28 = smov 0  }
   0x8   :  { %s2707_s29 = smov 0   ;;  %s2709_s30 = smov 0  }
   0x9   :  { %s2711_s7 = smov 0  }
   0xa LB: > { %s29_s8 = sadd.s32 1, %s2638_s28  ;;  %s32_s9 = sadd.s32 1, %s2642_s29  ;;  %s2650_s7 = sphi %s2711_s7, %s17_s7   ;;  %s2646_s30 = sphi %s2709_s30, %s3435_s30   ;;  %s2642_s29 = sphi %s2707_s29, %s3434_s29   ;;  %s2638_s28 = sphi %s2705_s28, %s3433_s28   ;;  %s2634_s27 = sphi %s2703_s27, %s3432_s27   ;;  %s2630_s26 = sphi %s2701_s26, %s3431_s26   ;;  %s2626_s25 = sphi %s2699_s25, %s3430_s25   ;;  %s2622_s24 = sphi %s2697_s24, %s3429_s24   ;;  %s2618_s23 = sphi %s2695_s23, %s3428_s23   ;;  %s2614_s22 = sphi %s2693_s22, %s3427_s22   ;;  %s2610_s21 = sphi %s2691_s21, %s3426_s21  }
   0xb   : > { %p30_p0 = scmp.ge.s32.totalorder %s29_s8, 2  ;;  %p52_p1 = scmp.ne.s32.totalorder %s2622_s24, %s2618_s23 }
   0xc   : > { %p53_p2 = scmp.eq.s32.totalorder %s2650_s7, 0  ;;  %s36_s10 = sadd.s32 1, %s2646_s30 }
   0xd   : > { %s3437_s8 = smov (%p30_p0, %s29_s8), 0  ;;  %s3439_s9 = smov (!%p30_p0, %s32_s9), %s2642_s29 }
   0xe   : > { %3412 = sst [smem:[#allocation9_spill]] %s3437_s8  ;;  %p34_p3 = scmp.ge.s32.totalorder %s3439_s9, 2 }
   0xf   : > { %s2130_s11 = sadd.s32 4294967295, %s2650_s7   ;;  %p2759_p4 = por %p53_p2, %p52_p1 }
  0x10   : > { %s3441_s9 = smov (%p34_p3, %s3439_s9), 0  ;;  %s3443_s10 = smov (!%p34_p3, %s36_s10), %s2646_s30 }
  0x11   : > { %3414 = sst [smem:[#allocation10_spill]] %s3441_s9  ;;  %s69_s13 = ssub.s32 %s2638_s28, %s3437_s8 }
  0x12   : > { %p80_p5 = scmp.ne.s32.totalorder %s2614_s22, %s2610_s21  ;;  %p38_p6 = scmp.ge.s32.totalorder %s3443_s10, 2 }
  0x13   : > { %p182_p7 = scmp.eq.s32.totalorder %s2130_s11, 7  ;;  %s41_s14 = ssub.s32 %s2642_s29, %s3441_s9 }
  0x14   : > { %p2772_p8 = por %p80_p5, %p53_p2  ;;  %s3445_s10 = smov (%p38_p6, %s3443_s10), 0 }
  0x15   : > { %3416 = sst [smem:[#allocation11_spill]] %s3445_s10  ;;  %s45_s16 = sadd.s32 1, %s2622_s24 }
  0x16   : > { %p2782_p9 = por %p182_p7, %p52_p1  ;;  %s40_s18 = ssub.s32 %s2646_s30, %s3445_s10 }
  0x17   : > { %s73_s19 = sadd.s32 1, %s2614_s22  ;;  %s42_s20 = sor.u32 %s41_s14, %s40_s18 }
  0x18   : > { %s3417_s17 = scalar_select %p2782_p9, 1, 0 }
  0x19   : > { %s70_s8 = sor.u32 %s69_s13, %s40_s18  ;;  %p43_p10 = scmp.eq.s32.totalorder %s42_s20, 0 }
  0x1a   : > { %3418 = sst [smem:[#allocation12_spill]] %s3417_s17  ;;  %p71_p11 = scmp.eq.s32.totalorder %s70_s8, 0 }
  0x1b   : > { %s2790_s11 = scalar_select %p43_p10, %s2622_s24, %s45_s16  }
  0x1c   : > { %s2793_s9 = scalar_select %p71_p11, %s2614_s22, %s73_s19  }
  0x1d   : > { %p2133_p12 = scmp.ge.s32.totalorder %s2650_s7, 8 }
  0x1f   : > { %238 = sbr.rel (%p2133_p12) target bundleno = 112 (0x70), region = 24 }
  0x24   : > { %241 = sbr.rel (!%p2759_p4) target bundleno = 62 (0x3e), region = 28  ;;  %s243_s5 = sand.u32 (%p2759_p4), 1, %s2622_s24  }
  0x25   : > { %s2368_s10 = smul.u32 (%p2759_p4), 48, %s2642_s29  ;;  %s2134_s17 = sshll.u32 (%p2759_p4), %s243_s5, 6 }
  0x26   : > { %s2369_s14 = smul.u32 (%p2759_p4), 96, %s2646_s30  ;;  %s3419_s0 = sld [smem:[#allocation13_spill]] (%p2759_p4) }
  0x27   : > { %s245_s5 = scalar_lea.vmem (%p2759_p4), [#allocation5], %s2134_s17 }
  0x28   : > { %s249_s13 = sadd.s32 (%p2759_p4), %s2369_s14, %s2368_s10 }
  0x29   : > { %s2137_s18 = sshll.u32 %s249_s13, 2 }
  0x2c   : > { %s2804_s19 = scalar_lea.vmem %s3419_s0, %s2137_s18 }
  0x2d   : > { %v268_v0 = vld [vmem:[%s2804_s19] sm:$0xf]  ;;  %v270_v1 = vld [vmem:[%s2804_s19 + $0xc] sm:$0xf]  ;;  %v272_v2 = vld [vmem:[%s2804_s19 + $0x18] sm:$0xf] }
  0x2e   : > { %269 = vst [vmem:[%s245_s5] sm:$0xf] %v268_v0  ;;  %v274_v3 = vld [vmem:[%s2804_s19 + $0x24] sm:$0xf]  ;;  %v276_v4 = vld [vmem:[%s2804_s19 + $0x30] sm:$0xf] }
  0x2f   : > { %271 = vst [vmem:[%s245_s5 + $0x4] sm:$0xf] %v270_v1  ;;  %v278_v5 = vld [vmem:[%s2804_s19 + $0x3c] sm:$0xf]  ;;  %v280_v6 = vld [vmem:[%s2804_s19 + $0x48] sm:$0xf] }
  0x30   : > { %273 = vst [vmem:[%s245_s5 + $0x8] sm:$0xf] %v272_v2  ;;  %v282_v7 = vld [vmem:[%s2804_s19 + $0x54] sm:$0xf]  ;;  %v284_v8 = vld [vmem:[%s2804_s19 + $0x60] sm:$0xf] }
  0x31   : > { %275 = vst [vmem:[%s245_s5 + $0xc] sm:$0xf] %v274_v3  ;;  %v286_v9 = vld [vmem:[%s2804_s19 + $0x6c] sm:$0xf]  ;;  %v288_v10 = vld [vmem:[%s2804_s19 + $0x78] sm:$0xf] }
  0x32   : > { %277 = vst [vmem:[%s245_s5 + $0x10] sm:$0xf] %v276_v4  ;;  %v290_v11 = vld [vmem:[%s2804_s19 + $0x84] sm:$0xf]  ;;  %v292_v12 = vld [vmem:[%s2804_s19 + $0x90] sm:$0xf] }
  0x33   : > { %279 = vst [vmem:[%s245_s5 + $0x14] sm:$0xf] %v278_v5  ;;  %v294_v13 = vld [vmem:[%s2804_s19 + $0x9c] sm:$0xf]  ;;  %v296_v14 = vld [vmem:[%s2804_s19 + $0xa8] sm:$0xf] }
  0x34   : > { %281 = vst [vmem:[%s245_s5 + $0x18] sm:$0xf] %v280_v6  ;;  %v298_v15 = vld [vmem:[%s2804_s19 + $0xb4] sm:$0xf] }
  0x35   : > { %283 = vst [vmem:[%s245_s5 + $0x1c] sm:$0xf] %v282_v7 }
  0x36   : > { %285 = vst [vmem:[%s245_s5 + $0x20] sm:$0xf] %v284_v8 }
  0x37   : > { %287 = vst [vmem:[%s245_s5 + $0x24] sm:$0xf] %v286_v9 }
  0x38   : > { %289 = vst [vmem:[%s245_s5 + $0x28] sm:$0xf] %v288_v10 }
  0x39   : > { %291 = vst [vmem:[%s245_s5 + $0x2c] sm:$0xf] %v290_v11 }
  0x3a   : > { %293 = vst [vmem:[%s245_s5 + $0x30] sm:$0xf] %v292_v12 }
  0x3b   : > { %295 = vst [vmem:[%s245_s5 + $0x34] sm:$0xf] %v294_v13 }
  0x3c   : > { %297 = vst [vmem:[%s245_s5 + $0x38] sm:$0xf] %v296_v14 }
  0x3d   : > { %299 = vst [vmem:[%s245_s5 + $0x3c] sm:$0xf] %v298_v15 }
  0x3e PF: > { %355 = sbr.rel (!%p2772_p8) target bundleno = 88 (0x58), region = 69  ;;  %s357_s10 = sand.u32 (%p2772_p8), 1, %s2614_s22  }
  0x3f   : > { %s2003_s12 = smul.u32 (%p2772_p8), 48, %s2638_s28  ;;  %s2138_s17 = sshll.u32 (%p2772_p8), %s357_s10, 6 }
  0x40   : > { %s2004_s20 = smul.u32 (%p2772_p8), 96, %s2646_s30  ;;  %s3420_s1 = sld [smem:[#allocation14_spill]] (%p2772_p8) }
  0x41   : > { %s359_s19 = scalar_lea.vmem (%p2772_p8), [#allocation6], %s2138_s17 }
  0x42   : > { %s2005_s14 = sadd.s32 (%p2772_p8), %s2004_s20, %s2003_s12 }
  0x43   : > { %s2139_s13 = sshll.u32 %s2005_s14, 2 }
  0x46   : > { %s2830_s16 = scalar_lea.vmem %s3420_s1, %s2139_s13 }
  0x47   : > { %v2140_v16 = vld [vmem:[%s2830_s16 + $0x4] sm:$0xf]  ;;  %v2141_v17 = vld [vmem:[%s2830_s16 + $0x10] sm:$0xf]  ;;  %v2142_v18 = vld [vmem:[%s2830_s16 + $0x1c] sm:$0xf] }
  0x48   : > { %384 = vst [vmem:[%s359_s19] sm:$0xf] %v2140_v16  ;;  %v2143_v19 = vld [vmem:[%s2830_s16 + $0x28] sm:$0xf]  ;;  %v2144_v20 = vld [vmem:[%s2830_s16 + $0x34] sm:$0xf] }
  0x49   : > { %386 = vst [vmem:[%s359_s19 + $0x4] sm:$0xf] %v2141_v17  ;;  %v2145_v21 = vld [vmem:[%s2830_s16 + $0x40] sm:$0xf]  ;;  %v2146_v22 = vld [vmem:[%s2830_s16 + $0x4c] sm:$0xf] }
  0x4a   : > { %388 = vst [vmem:[%s359_s19 + $0x8] sm:$0xf] %v2142_v18  ;;  %v2147_v23 = vld [vmem:[%s2830_s16 + $0x58] sm:$0xf]  ;;  %v2148_v24 = vld [vmem:[%s2830_s16 + $0x64] sm:$0xf] }
  0x4b   : > { %390 = vst [vmem:[%s359_s19 + $0xc] sm:$0xf] %v2143_v19  ;;  %v2149_v25 = vld [vmem:[%s2830_s16 + $0x70] sm:$0xf]  ;;  %v2150_v26 = vld [vmem:[%s2830_s16 + $0x7c] sm:$0xf] }
  0x4c   : > { %392 = vst [vmem:[%s359_s19 + $0x10] sm:$0xf] %v2144_v20  ;;  %v2151_v27 = vld [vmem:[%s2830_s16 + $0x88] sm:$0xf]  ;;  %v2152_v28 = vld [vmem:[%s2830_s16 + $0x94] sm:$0xf] }
  0x4d   : > { %394 = vst [vmem:[%s359_s19 + $0x14] sm:$0xf] %v2145_v21  ;;  %v2153_v29 = vld [vmem:[%s2830_s16 + $0xa0] sm:$0xf]  ;;  %v2154_v30 = vld [vmem:[%s2830_s16 + $0xac] sm:$0xf] }
  0x4e   : > { %396 = vst [vmem:[%s359_s19 + $0x18] sm:$0xf] %v2146_v22  ;;  %v2155_v31 = vld [vmem:[%s2830_s16 + $0xb8] sm:$0xf] }
  0x4f   : > { %398 = vst [vmem:[%s359_s19 + $0x1c] sm:$0xf] %v2147_v23 }
  0x50   : > { %400 = vst [vmem:[%s359_s19 + $0x20] sm:$0xf] %v2148_v24 }
  0x51   : > { %402 = vst [vmem:[%s359_s19 + $0x24] sm:$0xf] %v2149_v25 }
  0x52   : > { %404 = vst [vmem:[%s359_s19 + $0x28] sm:$0xf] %v2150_v26 }
  0x53   : > { %406 = vst [vmem:[%s359_s19 + $0x2c] sm:$0xf] %v2151_v27 }
  0x54   : > { %408 = vst [vmem:[%s359_s19 + $0x30] sm:$0xf] %v2152_v28 }
  0x55   : > { %410 = vst [vmem:[%s359_s19 + $0x34] sm:$0xf] %v2153_v29 }
  0x56   : > { %412 = vst [vmem:[%s359_s19 + $0x38] sm:$0xf] %v2154_v30 }
  0x57   : > { %414 = vst [vmem:[%s359_s19 + $0x3c] sm:$0xf] %v2155_v31 }
  0x58 PF: > { %470 = sbr.rel (!%p2772_p8) target bundleno = 112 (0x70), region = 110  ;;  %s472_s5 = sand.u32 (%p2772_p8), 1, %s2614_s22  }
  0x59   : > { %s2011_s10 = smul.u32 (%p2772_p8), 48, %s2638_s28  ;;  %s2156_s12 = sshll.u32 (%p2772_p8), %s472_s5, 6 }
  0x5a   : > { %s2012_s17 = smul.u32 (%p2772_p8), 96, %s2646_s30  ;;  %s474_s15 = scalar_lea.vmem (%p2772_p8), [#allocation7], %s2156_s12 }
  0x5c   : > { %s2013_s20 = sadd.s32 (%p2772_p8), %s2012_s17, %s2011_s10 }
  0x5d   : > { %s2157_s14 = sshll.u32 %s2013_s20, 2 }
  0x5e   : > { %s2856_s8 = scalar_lea.vmem %s3400_s2, %s2157_s14 }
  0x5f   : > { %v2158_v32 = vld [vmem:[%s2856_s8 + $0x8] sm:$0xf]  ;;  %v2159_v33 = vld [vmem:[%s2856_s8 + $0x14] sm:$0xf]  ;;  %v2160_v34 = vld [vmem:[%s2856_s8 + $0x20] sm:$0xf] }
  0x60   : > { %499 = vst [vmem:[%s474_s15] sm:$0xf] %v2158_v32  ;;  %v2161_v35 = vld [vmem:[%s2856_s8 + $0x2c] sm:$0xf]  ;;  %v2162_v36 = vld [vmem:[%s2856_s8 + $0x38] sm:$0xf] }
  0x61   : > { %501 = vst [vmem:[%s474_s15 + $0x4] sm:$0xf] %v2159_v33  ;;  %v2163_v37 = vld [vmem:[%s2856_s8 + $0x44] sm:$0xf]  ;;  %v2164_v38 = vld [vmem:[%s2856_s8 + $0x50] sm:$0xf] }
  0x62   : > { %503 = vst [vmem:[%s474_s15 + $0x8] sm:$0xf] %v2160_v34  ;;  %v2165_v39 = vld [vmem:[%s2856_s8 + $0x5c] sm:$0xf]  ;;  %v2166_v40 = vld [vmem:[%s2856_s8 + $0x68] sm:$0xf] }
  0x63   : > { %505 = vst [vmem:[%s474_s15 + $0xc] sm:$0xf] %v2161_v35  ;;  %v2167_v41 = vld [vmem:[%s2856_s8 + $0x74] sm:$0xf]  ;;  %v2168_v42 = vld [vmem:[%s2856_s8 + $0x80] sm:$0xf] }
  0x64   : > { %507 = vst [vmem:[%s474_s15 + $0x10] sm:$0xf] %v2162_v36  ;;  %v2169_v43 = vld [vmem:[%s2856_s8 + $0x8c] sm:$0xf]  ;;  %v2170_v44 = vld [vmem:[%s2856_s8 + $0x98] sm:$0xf] }
  0x65   : > { %509 = vst [vmem:[%s474_s15 + $0x14] sm:$0xf] %v2163_v37  ;;  %v2171_v45 = vld [vmem:[%s2856_s8 + $0xa4] sm:$0xf]  ;;  %v2172_v46 = vld [vmem:[%s2856_s8 + $0xb0] sm:$0xf] }
  0x66   : > { %511 = vst [vmem:[%s474_s15 + $0x18] sm:$0xf] %v2164_v38  ;;  %v2173_v47 = vld [vmem:[%s2856_s8 + $0xbc] sm:$0xf] }
  0x67   : > { %513 = vst [vmem:[%s474_s15 + $0x1c] sm:$0xf] %v2165_v39 }
  0x68   : > { %515 = vst [vmem:[%s474_s15 + $0x20] sm:$0xf] %v2166_v40 }
  0x69   : > { %517 = vst [vmem:[%s474_s15 + $0x24] sm:$0xf] %v2167_v41 }
  0x6a   : > { %519 = vst [vmem:[%s474_s15 + $0x28] sm:$0xf] %v2168_v42 }
  0x6b   : > { %521 = vst [vmem:[%s474_s15 + $0x2c] sm:$0xf] %v2169_v43 }
  0x6c   : > { %523 = vst [vmem:[%s474_s15 + $0x30] sm:$0xf] %v2170_v44 }
  0x6d   : > { %525 = vst [vmem:[%s474_s15 + $0x34] sm:$0xf] %v2171_v45 }
  0x6e   : > { %527 = vst [vmem:[%s474_s15 + $0x38] sm:$0xf] %v2172_v46 }
  0x6f   : > { %529 = vst [vmem:[%s474_s15 + $0x3c] sm:$0xf] %v2173_v47 }
  0x70 PF: > { %p2174_p13 = scmp.ge.s32.totalorder %s2650_s7, 1  ;;  %p584_p0 = scmp.lt.s32.totalorder %s2650_s7, 9 }
  0x72   : > { %p585_p1 = pnand %p2174_p13, %p584_p0 }
  0x73   : > { %s591_s16 = sand.u32 (!%p585_p1), 1, %s2618_s23   ;;  %s598_s19 = sand.u32 (!%p585_p1), 1, %s2610_s21  }
  0x74   : > { %588 = sbr.rel (%p585_p1) target bundleno = 1349 (0x545), region = 151  ;;  %s2175_s5 = sshll.u32 (!%p585_p1), %s591_s16, 6 }
  0x75   : > { %s2176_s10 = sshll.u32 (!%p585_p1), %s598_s19, 6  ;;  %p652_p2 = scmp.lt.s32.totalorder (!%p585_p1), %s2634_s27, 1 }
  0x76   : > { %p654_p3 = scmp.lt.s32.totalorder (!%p585_p1), %s2630_s26, 1  ;;  %s2887_s0 = scalar_lea.vmem (!%p585_p1), [#allocation5], %s2175_s5 }
  0x77   : > { %s2889_s1 = scalar_lea.vmem (!%p585_p1), [#allocation6], %s2176_s10  ;;  %s2891_s23 = scalar_lea.vmem (!%p585_p1), [#allocation7], %s2176_s10 }
  0x78   : > { %s2893_s21 = scalar_lea.vmem (!%p585_p1), [#allocation8], %s2175_s5  ;;  %p2181_p4 = scmp.ne.s32.totalorder (!%p585_p1), %s2626_s25, 0 }
  0x79   : > { %s653_s12 = scalar_select %p652_p2, %s2634_s27, 1 }
  0x7a   : > { %s655_s17 = scalar_select %p654_p3, %s2630_s26, 1 }
  0x7b   : > { %s2179_s20 = sshll.u32 %s653_s12, 1  ;;  %663 = sbr.rel (%p2181_p4) target bundleno = 177 (0xb1), region = 167 }
  0x7c   : > { %s657_s14 = sadd.s32 %s2179_s20, %s655_s17 }
  0x7d   : > { %s2180_s13 = sshll.u32 %s657_s14, 1 }
  0x7e   : > { %s2885_s15 = scalar_lea.vmem %s3404_s6, %s2180_s13 }
  0x80   : > { %vm664_vm0 = vcmask 7168   ;;  %v2652_v48 = vmov -inf   ;;  %v2653_v49 = vmov 0.0  }
  0x81   : > { %665 = vst.msk [vmem:[#allocation2] sm:$0xff] %vm664_vm0, %v2652_v48 }
  0x82   : > { %666 = vst.msk [vmem:[#allocation2 + $0x8] sm:$0xff] %vm664_vm0, %v2652_v48 }
  0x83   : > { %667 = vst.msk [vmem:[#allocation2 + $0x10] sm:$0xff] %vm664_vm0, %v2652_v48 }
  0x84   : > { %668 = vst.msk [vmem:[#allocation2 + $0x18] sm:$0xff] %vm664_vm0, %v2652_v48 }
  0x85   : > { %669 = vst.msk [vmem:[#allocation2 + $0x20] sm:$0xff] %vm664_vm0, %v2652_v48 }
  0x86   : > { %670 = vst.msk [vmem:[#allocation2 + $0x28] sm:$0xff] %vm664_vm0, %v2652_v48 }
  0x87   : > { %671 = vst.msk [vmem:[#allocation2 + $0x30] sm:$0xff] %vm664_vm0, %v2652_v48 }
  0x88   : > { %672 = vst.msk [vmem:[#allocation2 + $0x38] sm:$0xff] %vm664_vm0, %v2652_v48 }
  0x89   : > { %673 = vst.msk [vmem:[#allocation2 + $0x40] sm:$0xff] %vm664_vm0, %v2652_v48 }
  0x8a   : > { %674 = vst.msk [vmem:[#allocation2 + $0x48] sm:$0xff] %vm664_vm0, %v2652_v48 }
  0x8b   : > { %675 = vst.msk [vmem:[#allocation2 + $0x50] sm:$0xff] %vm664_vm0, %v2652_v48 }
  0x8c   : > { %676 = vst.msk [vmem:[#allocation2 + $0x58] sm:$0xff] %vm664_vm0, %v2652_v48 }
  0x8d   : > { %677 = vst.msk [vmem:[#allocation2 + $0x60] sm:$0xff] %vm664_vm0, %v2652_v48 }
  0x8e   : > { %678 = vst.msk [vmem:[#allocation2 + $0x68] sm:$0xff] %vm664_vm0, %v2652_v48 }
  0x8f   : > { %679 = vst.msk [vmem:[#allocation2 + $0x70] sm:$0xff] %vm664_vm0, %v2652_v48 }
  0x90   : > { %680 = vst.msk [vmem:[#allocation2 + $0x78] sm:$0xff] %vm664_vm0, %v2652_v48 }
  0x91   : > { %681 = vst.msk [vmem:[#allocation3] sm:$0xff] %vm664_vm0, %v2653_v49 }
  0x92   : > { %682 = vst.msk [vmem:[#allocation3 + $0x8] sm:$0xff] %vm664_vm0, %v2653_v49 }
  0x93   : > { %683 = vst.msk [vmem:[#allocation3 + $0x10] sm:$0xff] %vm664_vm0, %v2653_v49 }
  0x94   : > { %684 = vst.msk [vmem:[#allocation3 + $0x18] sm:$0xff] %vm664_vm0, %v2653_v49 }
  0x95   : > { %685 = vst.msk [vmem:[#allocation3 + $0x20] sm:$0xff] %vm664_vm0, %v2653_v49 }
  0x96   : > { %686 = vst.msk [vmem:[#allocation3 + $0x28] sm:$0xff] %vm664_vm0, %v2653_v49 }
  0x97   : > { %687 = vst.msk [vmem:[#allocation3 + $0x30] sm:$0xff] %vm664_vm0, %v2653_v49 }
  0x98   : > { %688 = vst.msk [vmem:[#allocation3 + $0x38] sm:$0xff] %vm664_vm0, %v2653_v49 }
  0x99   : > { %689 = vst.msk [vmem:[#allocation3 + $0x40] sm:$0xff] %vm664_vm0, %v2653_v49 }
  0x9a   : > { %690 = vst.msk [vmem:[#allocation3 + $0x48] sm:$0xff] %vm664_vm0, %v2653_v49 }
  0x9b   : > { %691 = vst.msk [vmem:[#allocation3 + $0x50] sm:$0xff] %vm664_vm0, %v2653_v49 }
  0x9c   : > { %692 = vst.msk [vmem:[#allocation3 + $0x58] sm:$0xff] %vm664_vm0, %v2653_v49 }
  0x9d   : > { %693 = vst.msk [vmem:[#allocation3 + $0x60] sm:$0xff] %vm664_vm0, %v2653_v49 }
  0x9e   : > { %694 = vst.msk [vmem:[#allocation3 + $0x68] sm:$0xff] %vm664_vm0, %v2653_v49 }
  0x9f   : > { %695 = vst.msk [vmem:[#allocation3 + $0x70] sm:$0xff] %vm664_vm0, %v2653_v49 }
  0xa0   : > { %696 = vst.msk [vmem:[#allocation3 + $0x78] sm:$0xff] %vm664_vm0, %v2653_v49 }
  0xa1   : > { %697 = vst [vmem:[#allocation4 + $0x30] sm:$0xff] %v2653_v49 }
  0xa2   : > { %698 = vst [vmem:[#allocation4] sm:$0xff] %v2653_v49 }
  0xa3   : > { %699 = vst [vmem:[#allocation4 + $0x58] sm:$0xff] %v2653_v49 }
  0xa4   : > { %700 = vst [vmem:[#allocation4 + $0x18] sm:$0xff] %v2653_v49 }
  0xa5   : > { %701 = vst [vmem:[#allocation4 + $0x50] sm:$0xff] %v2653_v49 }
  0xa6   : > { %702 = vst [vmem:[#allocation4 + $0x68] sm:$0xff] %v2653_v49 }
  0xa7   : > { %703 = vst [vmem:[#allocation4 + $0x8] sm:$0xff] %v2653_v49 }
  0xa8   : > { %704 = vst [vmem:[#allocation4 + $0x48] sm:$0xff] %v2653_v49 }
  0xa9   : > { %705 = vst [vmem:[#allocation4 + $0x40] sm:$0xff] %v2653_v49 }
  0xaa   : > { %706 = vst [vmem:[#allocation4 + $0x20] sm:$0xff] %v2653_v49 }
  0xab   : > { %707 = vst [vmem:[#allocation4 + $0x10] sm:$0xff] %v2653_v49 }
  0xac   : > { %708 = vst [vmem:[#allocation4 + $0x38] sm:$0xff] %v2653_v49 }
  0xad   : > { %709 = vst [vmem:[#allocation4 + $0x60] sm:$0xff] %v2653_v49 }
  0xae   : > { %710 = vst [vmem:[#allocation4 + $0x70] sm:$0xff] %v2653_v49 }
  0xaf   : > { %711 = vst [vmem:[#allocation4 + $0x78] sm:$0xff] %v2653_v49 }
  0xb0   : > { %712 = vst [vmem:[#allocation4 + $0x28] sm:$0xff] %v2653_v49 }
  0xb1 PF: > { %v2315_v50 = vld [vmem:[%s2889_s1 + $0x38] sm:$0xff]  ;;  %v2314_v51 = vld [vmem:[%s2889_s1 + $0x30] sm:$0xff]  ;;  %v2313_v52 = vld [vmem:[%s2889_s1 + $0x28] sm:$0xff]  ;;  %v2654_v18 = vmov 0   ;;  %vm1210_vm1 = vcmask 7168   ;;  %p2278_p5 = scmp.ne.s32.totalorder %s2626_s25, 1 }
  0xb2   : > { %841 = vmatpush.bf16.xpose.msra.mxu0 %v2315_v50  ;;  %2328 = vmatpush.bf16.xpose.msra.mxu2 %v2315_v50  ;;  %v2312_v53 = vld [vmem:[%s2889_s1 + $0x20] sm:$0xff]  ;;  %v2311_v54 = vld [vmem:[%s2889_s1 + $0x18] sm:$0xff]  ;;  %v2310_v55 = vld [vmem:[%s2889_s1 + $0x10] sm:$0xff] }
  0xb3   : > { %v2309_v56 = vld [vmem:[%s2889_s1 + $0x8] sm:$0xff]  ;;  %v2308_v57 = vld [vmem:[%s2889_s1] sm:$0xff]  ;;  %v2303_v59 = vld [vmem:[%s2887_s0 + $0x18] sm:$0xff]  ;;  %2462 = vset.pattern.permute.xlu1 %v2654_v18  ;;  %2463 = vset.pattern.permute.xlu2 %v2654_v18 }
  0xb4   : > { %v2300_v58 = vld [vmem:[%s2887_s0] sm:$0xff]  ;;  %v2301_v60 = vld [vmem:[%s2887_s0 + $0x8] sm:$0xff]  ;;  %v2302_v62 = vld [vmem:[%s2887_s0 + $0x10] sm:$0xff]  ;;  %2464 = vset.pattern.permute.xlu0 %v2654_v18 }
  0xb5   : > { %v2304_v61 = vld [vmem:[%s2887_s0 + $0x20] sm:$0xff]  ;;  %v2305_v63 = vld [vmem:[%s2887_s0 + $0x28] sm:$0xff]  ;;  %v2306_v0 = vld [vmem:[%s2887_s0 + $0x30] sm:$0xff] }
  0xb6   : > { %v2307_v1 = vld [vmem:[%s2887_s0 + $0x38] sm:$0xff]  ;;  %v2992_v19 = vld [vmem:[#allocation2] sm:$0xff]  ;;  %v3000_v22 = vld [vmem:[#allocation2 + $0x30] sm:$0xff] }
  0xb7   : > { %v3009_v26 = vld [vmem:[#allocation2 + $0x38] sm:$0xff]  ;;  %v3011_v28 = vld [vmem:[#allocation2 + $0x8] sm:$0xff]  ;;  %v3026_v33 = vld [vmem:[#allocation2 + $0x40] sm:$0xff] }
  0xb8   : > { %v3028_v34 = vld [vmem:[#allocation2 + $0x10] sm:$0xff]  ;;  %v3043_v40 = vld [vmem:[#allocation2 + $0x48] sm:$0xff]  ;;  %v893_v41 = vld [vmem:[#allocation2 + $0x18] sm:$0xff] }
  0xb9   : > { %v3045_v44 = vld [vmem:[#allocation2 + $0x20] sm:$0xff]  ;;  %v3059_v49 = vld [vmem:[#allocation2 + $0x50] sm:$0xff] }
  0xba   : > { %842 = vmatpush.bf16.xpose.msra.mxu0 %v2314_v51  ;;  %2329 = vmatpush.bf16.xpose.msra.mxu2 %v2314_v51  ;;  %v3061_v51 = vld [vmem:[#allocation2 + $0x28] sm:$0xff] }
  0xc2   : > { %843 = vmatpush.bf16.xpose.msra.mxu0 %v2313_v52  ;;  %2330 = vmatpush.bf16.xpose.msra.mxu2 %v2313_v52 }
  0xca   : > { %844 = vmatpush.bf16.xpose.msra.mxu0 %v2312_v53  ;;  %2331 = vmatpush.bf16.xpose.msra.mxu2 %v2312_v53 }
  0xd2   : > { %845 = vmatpush.bf16.xpose.msra.mxu0 %v2311_v54  ;;  %2332 = vmatpush.bf16.xpose.msra.mxu2 %v2311_v54 }
  0xda   : > { %846 = vmatpush.bf16.xpose.msra.mxu0 %v2310_v55  ;;  %2333 = vmatpush.bf16.xpose.msra.mxu2 %v2310_v55  ;;  %v3075_v55 = vld [vmem:[#allocation2 + $0x58] sm:$0xff] }
  0xe2   : > { %847 = vmatpush.bf16.xpose.msra.mxu0 %v2309_v56  ;;  %2334 = vmatpush.bf16.xpose.msra.mxu2 %v2309_v56 }
  0xea   : > { %848 = vmatpush.bf16.xpose.msra.mxu0 %v2308_v57  ;;  %2335 = vmatpush.bf16.xpose.msra.mxu2 %v2308_v57 }
  0xf1   : > { %849 = vmatmul.bf16.vlgmr.msra.gmra.mxu0 %v2300_v58  ;;  %864 = vmatmul.bf16.vlgmr.msra.gmra.mxu2 %v2303_v59  ;;  %v3084_v58 = vld [vmem:[#allocation2 + $0x60] sm:$0xff] }
 0x101   : > { %854 = vmatmul.bf16.gmra.mxu0 %v2301_v60  ;;  %869 = vmatmul.bf16.gmra.mxu2 %v2304_v61 }
 0x111   : > { %859 = vmatmul.bf16.gmra.mxu0 %v2302_v62  ;;  %874 = vmatmul.bf16.gmra.mxu2 %v2305_v63  ;;  %v3095_v62 = vld [vmem:[#allocation2 + $0x68] sm:$0xff] }
 0x121   : > { %879 = vmatmul.bf16.gmra.mxu2 %v2306_v0 }
 0x131   : > { %884 = vmatmul.bf16.gmra.mxu2 %v2307_v1 }
 0x16e   : > { %v2944_v2 = vpop.f32.mrf.mxu0 }
 0x16f   : > { %906 = vmax.xlane.f32.xlu0 %v2944_v2 }
 0x174   : > { %v2947_v3 = vpop.f32.mrf.mxu2 }
 0x176   : > { %v2949_v4 = vpop.f32.mrf.mxu0 }
 0x177   : > { %918 = vmax.xlane.f32.xlu0 %v2947_v3 }
 0x17c   : > { %v2952_v5 = vpop.f32.mrf.mxu2 }
 0x17d   : > { %920 = vmax.xlane.f32.xlu1 %v2952_v5 }
 0x17e   : > { %v2955_v6 = vpop.f32.mrf.mxu0 }
 0x17f   : > { %908 = vmax.xlane.f32.xlu0 %v2949_v4 }
 0x184   : > { %v2958_v7 = vpop.f32.mrf.mxu2 }
 0x185   : > { %922 = vmax.xlane.f32.xlu2 %v2958_v7  ;;  %910 = vmax.xlane.f32.xlu1 %v2955_v6 }
 0x186   : > { %v2962_v8 = vpop.f32.mrf.mxu0 }
 0x18c   : > { %v2964_v9 = vpop.f32.mrf.mxu2 }
 0x18d   : > { %924 = vmax.xlane.f32.xlu0 %v2964_v9  ;;  %912 = vmax.xlane.f32.xlu1 %v2962_v8 }
 0x18e   : > { %v2968_v10 = vpop.f32.mrf.mxu0 }
 0x18f   : > { %914 = vmax.xlane.f32.xlu2 %v2968_v10 }
 0x194   : > { %v2971_v11 = vpop.f32.mrf.mxu2 }
 0x195   : > { %926 = vmax.xlane.f32.xlu1 %v2971_v11 }
 0x196   : > { %v2974_v12 = vpop.f32.mrf.mxu0 }
 0x197   : > { %916 = vmax.xlane.f32.xlu2 %v2974_v12 }
 0x19c   : > { %v2977_v13 = vpop.f32.mrf.mxu2 }
 0x19f   : > { %928 = vmax.xlane.f32.xlu2 %v2977_v13 }
 0x1a4   : > { %v2980_v14 = vpop.f32.mrf.mxu2 }
 0x1a5   : > { %930 = vmax.xlane.f32.xlu0 %v2980_v14 }
 0x1ac   : > { %v2983_v15 = vpop.f32.mrf.mxu2 }
 0x1ad   : > { %932 = vmax.xlane.f32.xlu1 %v2983_v15 }
 0x1b4   : > { %v2986_v16 = vpop.f32.mrf.mxu2 }
 0x1b5   : > { %934 = vmax.xlane.f32.xlu2 %v2986_v16 }
 0x1bc   : > { %v2989_v17 = vpop.f32.mrf.mxu2 }
 0x1bd   : > { %936 = vmax.xlane.f32.xlu0 %v2989_v17 }
 0x1e2   : > { %v907_v20 = vpop.xlane.xlu0 %906 }
 0x1e3   : > { %v2995_v21 = vmax.f32 %v2992_v19, %v907_v20  ;;  %v2323_v20 = vld [vmem:[%s2891_s23 + $0x38] sm:$0xff] }
 0x1e4   : > { %1411 = vmatpush.bf16.msra.mxu1 %v2323_v20  ;;  %2336 = vmatpush.bf16.msra.mxu3 %v2323_v20 }
 0x1e5   : > { %1492 = vst.msk [vmem:[#allocation2] sm:$0xff] %vm1210_vm1, %v2995_v21  ;;  %1004 = vperm.xlu1 %2462, %v2995_v21   ;;  %v954_v61 = vsub.f32 %v2992_v19, %v2995_v21  ;;  %v3107_v21 = vld [vmem:[#allocation2 + $0x70] sm:$0xff] }
 0x1e7   : > { %v970_v1 = vmul.f32 1.442695, %v954_v61 }
 0x1e9   : > { %2465 = vpow2.f32 %v970_v1  ;;  %v2318_v1 = vld [vmem:[%s2891_s23 + $0x10] sm:$0xff] }
 0x1ea   : > { %v919_v23 = vpop.xlane.xlu0 %918 }
 0x1eb   : > { %v3003_v24 = vmax.f32 %v3000_v22, %v919_v23  ;;  %v2322_v23 = vld [vmem:[%s2891_s23 + $0x30] sm:$0xff] }
 0x1ec   : > { %1412 = vmatpush.bf16.msra.mxu1 %v2322_v23  ;;  %2337 = vmatpush.bf16.msra.mxu3 %v2322_v23 }
 0x1ed   : > { %v960_v25 = vsub.f32 %v3000_v22, %v3003_v24  ;;  %1498 = vst.msk [vmem:[#allocation2 + $0x30] sm:$0xff] %vm1210_vm1, %v3003_v24 }
 0x1f0   : > { %v921_v27 = vpop.xlane.xlu1 %920 }
 0x1f1   : > { %v3014_v29 = vmax.f32 %v3009_v26, %v921_v27 }
 0x1f2   : > { %v909_v30 = vpop.xlane.xlu0 %908 }
 0x1f3   : > { %v961_v31 = vsub.f32 %v3009_v26, %v3014_v29  ;;  %1499 = vst.msk [vmem:[#allocation2 + $0x38] sm:$0xff] %vm1210_vm1, %v3014_v29  ;;  %v3021_v32 = vmax.f32 %v3011_v28, %v909_v30 }
 0x1f5   : > { %1493 = vst.msk [vmem:[#allocation2 + $0x8] sm:$0xff] %vm1210_vm1, %v3021_v32  ;;  %1009 = vperm.xlu2 %2463, %v3021_v32  }
 0x1f8   : > { %v923_v35 = vpop.xlane.xlu2 %922  ;;  %v911_v36 = vpop.xlane.xlu1 %910 }
 0x1f9   : > { %v3031_v37 = vmax.f32 %v3026_v33, %v923_v35  ;;  %v3034_v38 = vmax.f32 %v3028_v34, %v911_v36  ;;  %v955_v36 = vsub.f32 %v3011_v28, %v3021_v32  ;;  %v3126_v28 = vld [vmem:[#allocation2 + $0x78] sm:$0xff] }
 0x1fb   : > { %v962_v39 = vsub.f32 %v3026_v33, %v3031_v37  ;;  %1500 = vst.msk [vmem:[#allocation2 + $0x40] sm:$0xff] %vm1210_vm1, %v3031_v37  ;;  %1014 = vperm.xlu0 %2464, %v3034_v38   ;;  %v972_v32 = vmul.f32 1.442695, %v955_v36 }
 0x1fc   : > { %1494 = vst.msk [vmem:[#allocation2 + $0x10] sm:$0xff] %vm1210_vm1, %v3034_v38 }
 0x1fd   : > { %v986_v23 = vmul.f32 1.442695, %v962_v39 }
 0x200   : > { %v925_v42 = vpop.xlane.xlu0 %924  ;;  %v913_v43 = vpop.xlane.xlu1 %912 }
 0x201   : > { %v3048_v45 = vmax.f32 %v3043_v40, %v925_v42  ;;  %v941_v46 = vmax.f32 %v893_v41, %v913_v43  ;;  %v956_v43 = vsub.f32 %v3028_v34, %v3034_v38  ;;  %v982_v34 = vmul.f32 1.442695, %v960_v25 }
 0x202   : > { %v915_v47 = vpop.xlane.xlu2 %914 }
 0x203   : > { %1501 = vst.msk [vmem:[#allocation2 + $0x48] sm:$0xff] %vm1210_vm1, %v3048_v45  ;;  %v3053_v48 = vmax.f32 %v3045_v44, %v915_v47  ;;  %1019 = vperm.xlu2 %2463, %v941_v46   ;;  %v957_v19 = vsub.f32 %v893_v41, %v941_v46  ;;  %v3120_v41 = vpop.eup %2465  ;;  %v974_v47 = vmul.f32 1.442695, %v956_v43  ;;  %v963_v25 = vsub.f32 %v3043_v40, %v3048_v45  ;;  %v2317_v40 = vld [vmem:[%s2891_s23 + $0x8] sm:$0xff] }
 0x204   : > { %1495 = vst.msk [vmem:[#allocation2 + $0x18] sm:$0xff] %vm1210_vm1, %v941_v46  ;;  %v2321_v46 = vld [vmem:[%s2891_s23 + $0x28] sm:$0xff] }
 0x205   : > { %1496 = vst.msk [vmem:[#allocation2 + $0x20] sm:$0xff] %vm1210_vm1, %v3053_v48  ;;  %1024 = vperm.xlu1 %2462, %v3053_v48   ;;  %v976_v35 = vmul.f32 1.442695, %v957_v19  ;;  %1413 = vmatpush.bf16.msra.mxu1 %v2321_v46  ;;  %v958_v38 = vsub.f32 %v3045_v44, %v3053_v48  ;;  %v984_v19 = vmul.f32 1.442695, %v961_v31 }
 0x206   : > { %2338 = vmatpush.bf16.msra.mxu3 %v2321_v46 }
 0x207   : > { %2467 = vpow2.f32 %v976_v35  ;;  %v978_v44 = vmul.f32 1.442695, %v958_v38  ;;  %v2316_v35 = vld [vmem:[%s2891_s23] sm:$0xff] }
 0x208   : > { %v927_v50 = vpop.xlane.xlu1 %926  ;;  %2469 = vpow2.f32 %v972_v32 }
 0x209   : > { %v3064_v52 = vmax.f32 %v3059_v49, %v927_v50  ;;  %2471 = vpow2.f32 %v974_v47 }
 0x20a   : > { %v917_v53 = vpop.xlane.xlu2 %916  ;;  %2473 = vpow2.f32 %v982_v34 }
 0x20b   : > { %1502 = vst.msk [vmem:[#allocation2 + $0x50] sm:$0xff] %vm1210_vm1, %v3064_v52  ;;  %v3069_v54 = vmax.f32 %v3061_v51, %v917_v53  ;;  %2475 = vpow2.f32 %v978_v44 }
 0x20d   : > { %1497 = vst.msk [vmem:[#allocation2 + $0x28] sm:$0xff] %vm1210_vm1, %v3069_v54  ;;  %1054 = vperm.xlu1 %2462, %v3064_v52   ;;  %1029 = vperm.xlu2 %2463, %v3069_v54   ;;  %v3143_v61 = vpop.eup %2467  ;;  %v959_v22 = vsub.f32 %v3061_v51, %v3069_v54  ;;  %v988_v51 = vmul.f32 1.442695, %v963_v25 }
 0x20f   : > { %v980_v48 = vmul.f32 1.442695, %v959_v22 }
 0x211   : > { %2477 = vpow2.f32 %v980_v48 }
 0x212   : > { %v929_v56 = vpop.xlane.xlu2 %928  ;;  %2479 = vpow2.f32 %v988_v51 }
 0x213   : > { %v3078_v57 = vmax.f32 %v3075_v55, %v929_v56  ;;  %v2320_v56 = vld [vmem:[%s2891_s23 + $0x20] sm:$0xff]  ;;  %2481 = vpow2.f32 %v984_v19 }
 0x214   : > { %1414 = vmatpush.bf16.msra.mxu1 %v2320_v56  ;;  %2339 = vmatpush.bf16.msra.mxu3 %v2320_v56  ;;  %2483 = vpow2.f32 %v986_v23 }
 0x215   : > { %1503 = vst.msk [vmem:[#allocation2 + $0x58] sm:$0xff] %vm1210_vm1, %v3078_v57  ;;  %1034 = vperm.xlu1 %2462, %v3003_v24   ;;  %1059 = vperm.xlu2 %2463, %v3078_v57   ;;  %v2319_v24 = vld [vmem:[%s2891_s23 + $0x18] sm:$0xff] }
 0x218   : > { %v931_v59 = vpop.xlane.xlu0 %930  ;;  %1415 = vmatpush.bf16.msra.mxu1 %v2319_v24  ;;  %2340 = vmatpush.bf16.msra.mxu3 %v2319_v24 }
 0x219   : > { %v3087_v60 = vmax.f32 %v3084_v58, %v931_v59 }
 0x21b   : > { %1504 = vst.msk [vmem:[#allocation2 + $0x60] sm:$0xff] %vm1210_vm1, %v3087_v60  ;;  %1064 = vperm.xlu0 %2464, %v3087_v60  }
 0x21c   : > { %1416 = vmatpush.bf16.msra.mxu1 %v2318_v1  ;;  %2341 = vmatpush.bf16.msra.mxu3 %v2318_v1 }
 0x21d   : > { %1039 = vperm.xlu1 %2462, %v3014_v29   ;;  %v965_v29 = vsub.f32 %v3075_v55, %v3078_v57 }
 0x21f   : > { %v992_v33 = vmul.f32 1.442695, %v965_v29 }
 0x220   : > { %v933_v63 = vpop.xlane.xlu1 %932  ;;  %1417 = vmatpush.bf16.msra.mxu1 %v2317_v40  ;;  %2342 = vmatpush.bf16.msra.mxu3 %v2317_v40 }
 0x221   : > { %v3098_v0 = vmax.f32 %v3095_v62, %v933_v63  ;;  %v3151_v63 = vpop.eup %2469 }
 0x222   : > { %v3154_v20 = vpop.eup %2471 }
 0x223   : > { %v967_v18 = vsub.f32 %v3095_v62, %v3098_v0  ;;  %1505 = vst.msk [vmem:[#allocation2 + $0x68] sm:$0xff] %vm1210_vm1, %v3098_v0  ;;  %1069 = vperm.xlu2 %2463, %v3098_v0   ;;  %v3158_v54 = vpop.eup %2473 }
 0x224   : > { %1418 = vmatpush.bf16.msra.mxu1 %v2316_v35  ;;  %2343 = vmatpush.bf16.msra.mxu3 %v2316_v35 }
 0x225   : > { %1044 = vperm.xlu1 %2462, %v3031_v37  }
 0x228   : > { %v935_v27 = vpop.xlane.xlu2 %934 }
 0x229   : > { %v3111_v30 = vmax.f32 %v3107_v21, %v935_v27  ;;  %v3170_v27 = vpop.eup %2475 }
 0x22a   : > { %v3173_v36 = vpop.eup %2477 }
 0x22b   : > { %v968_v42 = vsub.f32 %v3107_v21, %v3111_v30  ;;  %1506 = vst.msk [vmem:[#allocation2 + $0x70] sm:$0xff] %vm1210_vm1, %v3111_v30  ;;  %1074 = vperm.xlu0 %2464, %v3111_v30   ;;  %v3179_v26 = vpop.eup %2479 }
 0x22c   : > { %v3184_v37 = vpop.eup %2481 }
 0x22d   : > { %1245 = vperm.xlu1 %2462, %v3120_v41   ;;  %v3186_v39 = vpop.eup %2483 }
 0x230   : > { %v937_v50 = vpop.xlane.xlu0 %936 }
 0x231   : > { %v3129_v53 = vmax.f32 %v3126_v28, %v937_v50 }
 0x233   : > { %v969_v59 = vsub.f32 %v3126_v28, %v3129_v53  ;;  %1507 = vst.msk [vmem:[#allocation2 + $0x78] sm:$0xff] %vm1210_vm1, %v3129_v53  ;;  %1079 = vperm.xlu2 %2463, %v3129_v53   ;;  %1049 = vperm.xlu0 %2464, %v3048_v45   ;;  %v966_v45 = vsub.f32 %v3084_v58, %v3087_v60  ;;  %v998_v28 = vmul.f32 1.442695, %v968_v42  ;;  %v1228_v42 = vld [vmem:[#allocation4] sm:$0xff] }
 0x234   : > { %v964_v58 = vsub.f32 %v3059_v49, %v3064_v52 }
 0x235   : > { %1260 = vperm.xlu1 %2462, %v3143_v61   ;;  %v994_v43 = vmul.f32 1.442695, %v966_v45 }
 0x236   : > { %v990_v31 = vmul.f32 1.442695, %v964_v58 }
 0x237   : > { %2485 = vpow2.f32 %v994_v43 }
 0x238   : > { %2487 = vpow2.f32 %v990_v31 }
 0x239   : > { %2489 = vpow2.f32 %v992_v33 }
 0x23b   : > { %1250 = vperm.xlu2 %2463, %v3151_v63   ;;  %1255 = vperm.xlu0 %2464, %v3154_v20  }
 0x23d   : > { %1275 = vperm.xlu1 %2462, %v3158_v54   ;;  %v3190_v49 = vpop.eup %2485 }
 0x23e   : > { %v3193_v55 = vpop.eup %2487 }
 0x23f   : > { %v3195_v57 = vpop.eup %2489 }
 0x243   : > { %1270 = vperm.xlu2 %2463, %v3173_v36   ;;  %1265 = vperm.xlu0 %2464, %v3170_v27  }
 0x245   : > { %1290 = vperm.xlu1 %2462, %v3179_v26  }
 0x24b   : > { %1285 = vperm.xlu2 %2463, %v3186_v39   ;;  %1280 = vperm.xlu0 %2464, %v3184_v37  }
 0x24d   : > { %1305 = vperm.xlu1 %2462, %v3190_v49  }
 0x24f   : > { %v1010_v52 = vpop.permute.xlu2 %1009 }
 0x250   : > { %v1083_v60 = vsub.f32 %v2949_v4, %v1010_v52 }
 0x252   : > { %v1100_v46 = vmul.f32 1.442695, %v1083_v60 }
 0x253   : > { %1300 = vperm.xlu2 %2463, %v3195_v57   ;;  %1295 = vperm.xlu0 %2464, %v3193_v55  }
 0x254   : > { %2491 = vpow2.f32 %v1100_v46 }
 0x257   : > { %v1005_v32 = vpop.permute.xlu1 %1004 }
 0x258   : > { %v1082_v47 = vsub.f32 %v2944_v2, %v1005_v32 }
 0x25a   : > { %v1098_v50 = vmul.f32 1.442695, %v1082_v47  ;;  %v2492_v56 = vpop.eup %2491 }
 0x25c   : > { %2493 = vpow2.f32 %v1098_v50 }
 0x25d   : > { %v1020_v22 = vpop.permute.xlu2 %1019 }
 0x25e   : > { %v1085_v24 = vsub.f32 %v2962_v8, %v1020_v22 }
 0x260   : > { %v1104_v25 = vmul.f32 1.442695, %v1085_v24 }
 0x262   : > { %v2494_v34 = vpop.eup %2493  ;;  %2495 = vpow2.f32 %v1104_v25 }
 0x263   : > { %v1339_v38 = vpack.c.bf16 %v2492_v56, %v2494_v34 }
 0x265   : > { %1419 = vmatmul.bf16.vlgmr.msra.gmra.mxu1 %v1339_v38 }
 0x267   : > { %v1030_v44 = vpop.permute.xlu2 %1029 }
 0x268   : > { %v3203_v51 = vpop.eup %2495  ;;  %v1087_v8 = vsub.f32 %v2974_v12, %v1030_v44 }
 0x26d   : > { %v1015_v4 = vpop.permute.xlu0 %1014 }
 0x26e   : > { %v1084_v48 = vsub.f32 %v2955_v6, %v1015_v4  ;;  %v1108_v6 = vmul.f32 1.442695, %v1087_v8 }
 0x26f   : > { %v1060_v45 = vpop.permute.xlu2 %1059 }
 0x270   : > { %v1102_v1 = vmul.f32 1.442695, %v1084_v48  ;;  %v1093_v35 = vsub.f32 %v2977_v13, %v1060_v45 }
 0x272   : > { %2497 = vpow2.f32 %v1102_v1  ;;  %v1120_v58 = vmul.f32 1.442695, %v1093_v35 }
 0x277   : > { %v1025_v2 = vpop.permute.xlu1 %1024  ;;  %1164 = vadd.xlane.f32.xlu1 %v2492_v56 }
 0x278   : > { %v2498_v40 = vpop.eup %2497  ;;  %v1086_v19 = vsub.f32 %v2968_v10, %v1025_v2 }
 0x279   : > { %v1340_v23 = vpack.c.bf16 %v3203_v51, %v2498_v40 }
 0x27a   : > { %v1106_v43 = vmul.f32 1.442695, %v1086_v19 }
 0x27b   : > { %1424 = vmatmul.bf16.gmra.mxu1 %v1340_v23 }
 0x27c   : > { %1162 = vadd.xlane.f32.xlu2 %v2494_v34  ;;  %2499 = vpow2.f32 %v1106_v43 }
 0x27d   : > { %2501 = vpow2.f32 %v1108_v6  ;;  %v1070_v46 = vpop.permute.xlu2 %1069 }
 0x27e   : > { %2503 = vpow2.f32 %v1120_v58  ;;  %v1095_v56 = vsub.f32 %v2983_v15, %v1070_v46 }
 0x27f   : > { %v1055_v29 = vpop.permute.xlu1 %1054 }
 0x280   : > { %v1092_v31 = vsub.f32 %v2971_v11, %v1055_v29  ;;  %v1124_v22 = vmul.f32 1.442695, %v1095_v56 }
 0x282   : > { %v1118_v33 = vmul.f32 1.442695, %v1092_v31  ;;  %v2500_v10 = vpop.eup %2499 }
 0x283   : > { %v2502_v60 = vpop.eup %2501 }
 0x284   : > { %2505 = vpow2.f32 %v1118_v33  ;;  %v2504_v13 = vpop.eup %2503  ;;  %v1341_v32 = vpack.c.bf16 %v2502_v60, %v2500_v10 }
 0x287   : > { %v1035_v52 = vpop.permute.xlu1 %1034 }
 0x288   : > { %v1088_v12 = vsub.f32 %v2947_v3, %v1035_v52 }
 0x28a   : > { %v2506_v47 = vpop.eup %2505  ;;  %v1110_v50 = vmul.f32 1.442695, %v1088_v12 }
 0x28b   : > { %1429 = vmatmul.bf16.gmra.mxu1 %v1341_v32  ;;  %v1344_v34 = vpack.c.bf16 %v2504_v13, %v2506_v47  ;;  %v996_v32 = vmul.f32 1.442695, %v967_v18  ;;  %v1227_v18 = vld [vmem:[#allocation4 + $0x30] sm:$0xff] }
 0x28c   : > { %2507 = vpow2.f32 %v1110_v50 }
 0x28d   : > { %v1065_v11 = vpop.permute.xlu0 %1064  ;;  %1444 = vmatmul.bf16.vlgmr.msra.gmra.mxu3 %v1344_v34  ;;  %v1080_v45 = vpop.permute.xlu2 %1079 }
 0x28e   : > { %v1094_v38 = vsub.f32 %v2980_v14, %v1065_v11  ;;  %v1131_v11 = vld [vmem:[#allocation3 + $0x8] sm:$0xff] }
 0x28f   : > { %v1040_v24 = vpop.permute.xlu1 %1039 }
 0x290   : > { %v1122_v25 = vmul.f32 1.442695, %v1094_v38  ;;  %v1089_v4 = vsub.f32 %v2952_v5, %v1040_v24  ;;  %v1097_v5 = vsub.f32 %v2989_v17, %v1080_v45 }
 0x292   : > { %v2508_v44 = vpop.eup %2507  ;;  %2509 = vpow2.f32 %v1122_v25  ;;  %v1112_v3 = vmul.f32 1.442695, %v1089_v4  ;;  %v1128_v6 = vmul.f32 1.442695, %v1097_v5  ;;  %v1147_v25 = vmul.f32 %v3151_v63, %v1131_v11  ;;  %v1230_v5 = vld [vmem:[#allocation4 + $0x18] sm:$0xff] }
 0x293   : > { %2511 = vpow2.f32 %v1124_v22  ;;  %1174 = vadd.xlane.f32.xlu0 %v2508_v44 }
 0x294   : > { %2513 = vpow2.f32 %v1112_v3 }
 0x297   : > { %v1045_v48 = vpop.permute.xlu1 %1044 }
 0x298   : > { %v2510_v15 = vpop.eup %2509  ;;  %v1090_v1 = vsub.f32 %v2958_v7, %v1045_v48 }
 0x299   : > { %v2512_v2 = vpop.eup %2511 }
 0x29a   : > { %v2514_v19 = vpop.eup %2513  ;;  %v1114_v23 = vmul.f32 1.442695, %v1090_v1  ;;  %v1345_v8 = vpack.c.bf16 %v2512_v2, %v2510_v15 }
 0x29b   : > { %1166 = vadd.xlane.f32.xlu0 %v2498_v40  ;;  %1176 = vadd.xlane.f32.xlu1 %v2514_v19  ;;  %v1342_v14 = vpack.c.bf16 %v2514_v19, %v2508_v44  ;;  %v1229_v19 = vld [vmem:[#allocation4 + $0x58] sm:$0xff] }
 0x29c   : > { %2515 = vpow2.f32 %v1114_v23 }
 0x29d   : > { %v1075_v35 = vpop.permute.xlu0 %1074  ;;  %1434 = vmatmul.bf16.gmra.mxu1 %v1342_v14  ;;  %1449 = vmatmul.bf16.gmra.mxu3 %v1345_v8 }
 0x29e   : > { %v1096_v43 = vsub.f32 %v2986_v16, %v1075_v35 }
 0x2a0   : > { %v1126_v58 = vmul.f32 1.442695, %v1096_v43 }
 0x2a2   : > { %v2516_v29 = vpop.eup %2515  ;;  %2517 = vpow2.f32 %v1126_v58 }
 0x2a3   : > { %1178 = vadd.xlane.f32.xlu2 %v2516_v29  ;;  %1170 = vadd.xlane.f32.xlu1 %v2500_v10  ;;  %2519 = vpow2.f32 %v1128_v6  ;;  %v1246_v10 = vpop.permute.xlu1 %1245 }
 0x2a4   : > { %v1323_v56 = vmul.f32 %v1246_v10, %v1227_v18  ;;  %v1232_v10 = vld [vmem:[#allocation4 + $0x68] sm:$0xff] }
 0x2a5   : > { %v1050_v7 = vpop.permute.xlu0 %1049 }
 0x2a6   : > { %v1091_v40 = vsub.f32 %v2964_v9, %v1050_v7  ;;  %v1000_v9 = vmul.f32 1.442695, %v969_v59  ;;  %v1231_v7 = vld [vmem:[#allocation4 + $0x50] sm:$0xff] }
 0x2a8   : > { %v2518_v31 = vpop.eup %2517  ;;  %v1116_v33 = vmul.f32 1.442695, %v1091_v40 }
 0x2a9   : > { %v2520_v52 = vpop.eup %2519 }
 0x2aa   : > { %2521 = vpow2.f32 %v1116_v33  ;;  %v1346_v17 = vpack.c.bf16 %v2520_v52, %v2518_v31 }
 0x2ab   : > { %1182 = vadd.xlane.f32.xlu1 %v2506_v47  ;;  %1168 = vadd.xlane.f32.xlu2 %v3203_v51  ;;  %v1261_v12 = vpop.permute.xlu1 %1260  ;;  %2523 = vpow2.f32 %v1000_v9  ;;  %v1251_v51 = vpop.permute.xlu2 %1250  ;;  %v1237_v9 = vld [vmem:[#allocation4 + $0x10] sm:$0xff] }
 0x2ac   : > { %2525 = vpow2.f32 %v996_v32  ;;  %v1324_v22 = vmul.f32 %v1251_v51, %v1228_v42  ;;  %v1326_v43 = vmul.f32 %v1261_v12, %v1230_v5  ;;  %v1234_v5 = vld [vmem:[#allocation4 + $0x48] sm:$0xff] }
 0x2ad   : > { %1454 = vmatmul.bf16.gmra.mxu3 %v1346_v17  ;;  %2527 = vpow2.f32 %v998_v28  ;;  %v1256_v50 = vpop.permute.xlu0 %1255 }
 0x2ae   : > { %v1325_v14 = vmul.f32 %v1256_v50, %v1229_v19 }
 0x2b0   : > { %v2522_v16 = vpop.eup %2521 }
 0x2b1   : > { %1180 = vadd.xlane.f32.xlu0 %v2522_v16  ;;  %v1343_v46 = vpack.c.bf16 %v2522_v16, %v2516_v29  ;;  %v3225_v47 = vpop.eup %2523  ;;  %v1136_v29 = vld [vmem:[#allocation3 + $0x30] sm:$0xff] }
 0x2b2   : > { %v3233_v59 = vpop.eup %2525  ;;  %v1132_v16 = vld [vmem:[#allocation3 + $0x10] sm:$0xff] }
 0x2b3   : > { %1172 = vadd.xlane.f32.xlu2 %v2502_v60  ;;  %1439 = vmatmul.bf16.gmra.mxu1 %v1343_v46  ;;  %v3228_v60 = vpop.permute.xlu1 %1275  ;;  %v1271_v53 = vpop.permute.xlu2 %1270  ;;  %v1137_v46 = vld [vmem:[#allocation3 + $0x38] sm:$0xff]  ;;  %v1148_v12 = vmul.f32 %v3154_v20, %v1132_v16 }
 0x2b4   : > { %1188 = vadd.xlane.f32.xlu1 %v2512_v2  ;;  %v3238_v62 = vpop.eup %2527  ;;  %v1153_v51 = vmul.f32 %v3184_v37, %v1137_v46  ;;  %v1328_v18 = vmul.f32 %v1271_v53, %v1232_v10  ;;  %v1238_v20 = vld [vmem:[#allocation4 + $0x38] sm:$0xff] }
 0x2b5   : > { %v1266_v24 = vpop.permute.xlu0 %1265 }
 0x2b9   : > { %1186 = vadd.xlane.f32.xlu0 %v2510_v15  ;;  %v1130_v15 = vld [vmem:[#allocation3] sm:$0xff] }
 0x2ba   : > { %v1146_v1 = vmul.f32 %v3120_v41, %v1130_v15  ;;  %v1152_v41 = vmul.f32 %v3158_v54, %v1136_v29 }
 0x2bb   : > { %1184 = vadd.xlane.f32.xlu2 %v2504_v13  ;;  %v3236_v13 = vpop.permute.xlu1 %1290  ;;  %v3241_v0 = vpop.permute.xlu2 %1285 }
 0x2bd   : > { %v3251_v23 = vpop.permute.xlu0 %1280 }
 0x2c1   : > { %1192 = vadd.xlane.f32.xlu0 %v2520_v52 }
 0x2c3   : > { %1190 = vadd.xlane.f32.xlu2 %v2518_v31  ;;  %v3243_v34 = vpop.permute.xlu1 %1305  ;;  %v3245_v38 = vpop.permute.xlu2 %1300  ;;  %v1327_v31 = vmul.f32 %v1266_v24, %v1231_v7  ;;  %v1138_v24 = vld [vmem:[#allocation3 + $0x40] sm:$0xff]  ;;  %v1139_v7 = vld [vmem:[#allocation3 + $0x48] sm:$0xff] }
 0x2c4   : > { %v1154_v53 = vmul.f32 %v3186_v39, %v1138_v24  ;;  %v1236_v24 = vld [vmem:[#allocation4 + $0x20] sm:$0xff] }
 0x2c5   : > { %v1296_v35 = vpop.permute.xlu0 %1295 }
 0x2c6   : > { %v1333_v54 = vmul.f32 %v1296_v35, %v1237_v9 }
 0x2cd   : > { %1320 = vperm.xlu1 %2462, %v3225_v47  }
 0x2d5   : > { %1310 = vperm.xlu0 %2464, %v3233_v59  }
 0x2db   : > { %1315 = vperm.xlu2 %2463, %v3238_v62  }
 0x2e2   : > { %v1420_v21 = vpop.f32.mrf.mxu1 }
 0x2e3   : > { %v1460_v30 = vadd.f32 %v1420_v21, %v1323_v56 }
 0x2e5   : > { %1476 = vst [vmem:[#allocation4 + $0x30] sm:$0xff] %v1460_v30 }
 0x2ea   : > { %v1165_v4 = vpop.xlane.xlu1 %1164  ;;  %v1422_v44 = vpop.f32.mrf.mxu1 }
 0x2eb   : > { %v1195_v3 = vadd.f32 %v1165_v4, %v1147_v25  ;;  %v1461_v48 = vadd.f32 %v1422_v44, %v1324_v22  ;;  %v1134_v22 = vld [vmem:[#allocation3 + $0x20] sm:$0xff]  ;;  %v1233_v25 = vld [vmem:[#allocation4 + $0x8] sm:$0xff] }
 0x2ec   : > { %v1150_v37 = vmul.f32 %v3170_v27, %v1134_v22  ;;  %v1133_v27 = vld [vmem:[#allocation3 + $0x18] sm:$0xff]  ;;  %v1144_v22 = vld [vmem:[#allocation3 + $0x70] sm:$0xff] }
 0x2ed   : > { %1212 = vst.msk [vmem:[#allocation3 + $0x8] sm:$0xff] %vm1210_vm1, %v1195_v3  ;;  %v1334_v3 = vmul.f32 %v3245_v38, %v1238_v20  ;;  %v1149_v38 = vmul.f32 %v3143_v61, %v1133_v27 }
 0x2ee   : > { %1477 = vst [vmem:[#allocation4] sm:$0xff] %v1461_v48 }
 0x2ef   : > { %v1163_v2 = vpop.xlane.xlu2 %1162 }
 0x2f0   : > { %v1194_v45 = vadd.f32 %v1163_v2, %v1146_v1  ;;  %v1329_v2 = vmul.f32 %v3228_v60, %v1233_v25 }
 0x2f2   : > { %1211 = vst.msk [vmem:[#allocation3] sm:$0xff] %vm1210_vm1, %v1194_v45 }
 0x2f8   : > { %v1425_v8 = vpop.f32.mrf.mxu1 }
 0x2f9   : > { %v1462_v63 = vadd.f32 %v1425_v8, %v1325_v14  ;;  %v1140_v14 = vld [vmem:[#allocation3 + $0x50] sm:$0xff]  ;;  %v1239_v8 = vld [vmem:[#allocation4 + $0x60] sm:$0xff] }
 0x2fa   : > { %v1335_v60 = vmul.f32 %v3243_v34, %v1239_v8 }
 0x2fb   : > { %1478 = vst [vmem:[#allocation4 + $0x58] sm:$0xff] %v1462_v63  ;;  %v1156_v63 = vmul.f32 %v3193_v55, %v1140_v14  ;;  %v1135_v55 = vld [vmem:[#allocation3 + $0x28] sm:$0xff] }
 0x2fc   : > { %v1151_v16 = vmul.f32 %v3173_v36, %v1135_v55 }
 0x300   : > { %v1427_v6 = vpop.f32.mrf.mxu1 }
 0x301   : > { %v1463_v58 = vadd.f32 %v1427_v6, %v1326_v43 }
 0x303   : > { %1479 = vst [vmem:[#allocation4 + $0x18] sm:$0xff] %v1463_v58 }
 0x306   : > { %v1175_v40 = vpop.xlane.xlu0 %1174 }
 0x307   : > { %v1200_v33 = vadd.f32 %v1175_v40, %v1152_v41  ;;  %v1330_v41 = vmul.f32 %v3251_v23, %v1234_v5 }
 0x308   : > { %v1430_v52 = vpop.f32.mrf.mxu1 }
 0x309   : > { %1217 = vst.msk [vmem:[#allocation3 + $0x30] sm:$0xff] %vm1210_vm1, %v1200_v33  ;;  %v1464_v17 = vadd.f32 %v1430_v52, %v1327_v31  ;;  %v1155_v33 = vmul.f32 %v3179_v26, %v1139_v7  ;;  %v1143_v52 = vld [vmem:[#allocation3 + $0x68] sm:$0xff]  ;;  %v1141_v26 = vld [vmem:[#allocation3 + $0x58] sm:$0xff] }
 0x30a   : > { %v1159_v46 = vmul.f32 %v3233_v59, %v1143_v52  ;;  %v1157_v59 = vmul.f32 %v3195_v57, %v1141_v26  ;;  %v1160_v57 = vmul.f32 %v3238_v62, %v1144_v22 }
 0x30b   : > { %1480 = vst [vmem:[#allocation4 + $0x50] sm:$0xff] %v1464_v17 }
 0x30e   : > { %v1167_v32 = vpop.xlane.xlu0 %1166  ;;  %v1177_v28 = vpop.xlane.xlu1 %1176 }
 0x30f   : > { %v1196_v50 = vadd.f32 %v1167_v32, %v1148_v12  ;;  %v1201_v56 = vadd.f32 %v1177_v28, %v1153_v51  ;;  %v1142_v51 = vld [vmem:[#allocation3 + $0x60] sm:$0xff] }
 0x310   : > { %v1432_v21 = vpop.f32.mrf.mxu1  ;;  %v1445_v30 = vpop.f32.mrf.mxu3  ;;  %v1158_v32 = vmul.f32 %v3190_v49, %v1142_v51  ;;  %v1235_v28 = vld [vmem:[#allocation4 + $0x40] sm:$0xff] }
 0x311   : > { %1213 = vst.msk [vmem:[#allocation3 + $0x10] sm:$0xff] %vm1210_vm1, %v1196_v50  ;;  %v1465_v42 = vadd.f32 %v1432_v21, %v1328_v18  ;;  %v1470_v11 = vadd.f32 %v1445_v30, %v1333_v54 }
 0x312   : > { %1218 = vst.msk [vmem:[#allocation3 + $0x38] sm:$0xff] %vm1210_vm1, %v1201_v56  ;;  %v1331_v56 = vmul.f32 %v3241_v0, %v1235_v28  ;;  %v1332_v0 = vmul.f32 %v3236_v13, %v1236_v24  ;;  %v1240_v13 = vld [vmem:[#allocation4 + $0x70] sm:$0xff] }
 0x313   : > { %1481 = vst [vmem:[#allocation4 + $0x68] sm:$0xff] %v1465_v42  ;;  %v1145_v42 = vld [vmem:[#allocation3 + $0x78] sm:$0xff] }
 0x314   : > { %1486 = vst [vmem:[#allocation4 + $0x10] sm:$0xff] %v1470_v11  ;;  %v1161_v49 = vmul.f32 %v3225_v47, %v1145_v42 }
 0x316   : > { %v1171_v4 = vpop.xlane.xlu1 %1170  ;;  %v1179_v44 = vpop.xlane.xlu2 %1178 }
 0x317   : > { %v1198_v48 = vadd.f32 %v1171_v4, %v1150_v37  ;;  %v1202_v15 = vadd.f32 %v1179_v44, %v1154_v53 }
 0x318   : > { %v1447_v1 = vpop.f32.mrf.mxu3 }
 0x319   : > { %1215 = vst.msk [vmem:[#allocation3 + $0x20] sm:$0xff] %vm1210_vm1, %v1198_v48  ;;  %v1471_v45 = vadd.f32 %v1447_v1, %v1334_v3  ;;  %v1241_v48 = vld [vmem:[#allocation4 + $0x78] sm:$0xff] }
 0x31a   : > { %1219 = vst.msk [vmem:[#allocation3 + $0x40] sm:$0xff] %vm1210_vm1, %v1202_v15  ;;  %v1435_v19 = vpop.f32.mrf.mxu1  ;;  %v1242_v15 = vld [vmem:[#allocation4 + $0x28] sm:$0xff] }
 0x31b   : > { %1487 = vst [vmem:[#allocation4 + $0x38] sm:$0xff] %v1471_v45  ;;  %v1466_v39 = vadd.f32 %v1435_v19, %v1329_v2 }
 0x31d   : > { %1482 = vst [vmem:[#allocation4 + $0x8] sm:$0xff] %v1466_v39 }
 0x31e   : > { %v1183_v35 = vpop.xlane.xlu1 %1182  ;;  %v1169_v43 = vpop.xlane.xlu2 %1168 }
 0x31f   : > { %v1204_v6 = vadd.f32 %v1183_v35, %v1156_v63  ;;  %v1197_v58 = vadd.f32 %v1169_v43, %v1149_v38 }
 0x320   : > { %v1450_v29 = vpop.f32.mrf.mxu3 }
 0x321   : > { %1221 = vst.msk [vmem:[#allocation3 + $0x50] sm:$0xff] %vm1210_vm1, %v1204_v6  ;;  %v1472_v40 = vadd.f32 %v1450_v29, %v1335_v60 }
 0x322   : > { %1214 = vst.msk [vmem:[#allocation3 + $0x18] sm:$0xff] %vm1210_vm1, %v1197_v58  ;;  %v1437_v31 = vpop.f32.mrf.mxu1 }
 0x323   : > { %1488 = vst [vmem:[#allocation4 + $0x60] sm:$0xff] %v1472_v40  ;;  %v1467_v61 = vadd.f32 %v1437_v31, %v1330_v41 }
 0x324   : > { %v1181_v17 = vpop.xlane.xlu0 %1180 }
 0x325   : > { %1483 = vst [vmem:[#allocation4 + $0x48] sm:$0xff] %v1467_v61  ;;  %v1203_v34 = vadd.f32 %v1181_v17, %v1155_v33 }
 0x326   : > { %v1173_v23 = vpop.xlane.xlu2 %1172 }
 0x327   : > { %1220 = vst.msk [vmem:[#allocation3 + $0x48] sm:$0xff] %vm1210_vm1, %v1203_v34  ;;  %v1189_v10 = vpop.xlane.xlu1 %1188  ;;  %v1199_v9 = vadd.f32 %v1173_v23, %v1151_v16 }
 0x328   : > { %v1207_v12 = vadd.f32 %v1189_v10, %v1159_v46  ;;  %v1452_v54 = vpop.f32.mrf.mxu3 }
 0x329   : > { %1216 = vst.msk [vmem:[#allocation3 + $0x28] sm:$0xff] %vm1210_vm1, %v1199_v9 }
 0x32a   : > { %1224 = vst.msk [vmem:[#allocation3 + $0x68] sm:$0xff] %vm1210_vm1, %v1207_v12 }
 0x32c   : > { %v1187_v18 = vpop.xlane.xlu0 %1186 }
 0x32d   : > { %v1206_v36 = vadd.f32 %v1187_v18, %v1158_v32 }
 0x32e   : > { %v1185_v50 = vpop.xlane.xlu2 %1184 }
 0x32f   : > { %1223 = vst.msk [vmem:[#allocation3 + $0x60] sm:$0xff] %vm1210_vm1, %v1206_v36  ;;  %v1205_v21 = vadd.f32 %v1185_v50, %v1157_v59 }
 0x330   : > { %v1440_v30 = vpop.f32.mrf.mxu1  ;;  %v1455_v25 = vpop.f32.mrf.mxu3 }
 0x331   : > { %1222 = vst.msk [vmem:[#allocation3 + $0x58] sm:$0xff] %vm1210_vm1, %v1205_v21  ;;  %v1468_v11 = vadd.f32 %v1440_v30, %v1331_v56 }
 0x333   : > { %1484 = vst [vmem:[#allocation4 + $0x40] sm:$0xff] %v1468_v11 }
 0x334   : > { %v1193_v20 = vpop.xlane.xlu0 %1192 }
 0x335   : > { %v1209_v37 = vadd.f32 %v1193_v20, %v1161_v49 }
 0x336   : > { %v1191_v53 = vpop.xlane.xlu2 %1190 }
 0x337   : > { %1226 = vst.msk [vmem:[#allocation3 + $0x78] sm:$0xff] %vm1210_vm1, %v1209_v37  ;;  %v1208_v4 = vadd.f32 %v1191_v53, %v1160_v57 }
 0x338   : > { %v1442_v44 = vpop.f32.mrf.mxu1  ;;  %v1457_v19 = vpop.f32.mrf.mxu3 }
 0x339   : > { %1225 = vst.msk [vmem:[#allocation3 + $0x70] sm:$0xff] %vm1210_vm1, %v1208_v4  ;;  %v1469_v3 = vadd.f32 %v1442_v44, %v1332_v0 }
 0x33b   : > { %1485 = vst [vmem:[#allocation4 + $0x20] sm:$0xff] %v1469_v3 }
 0x33e   : > { %v1316_v47 = vpop.permute.xlu2 %1315 }
 0x33f   : > { %v1321_v1 = vpop.permute.xlu1 %1320  ;;  %v1337_v2 = vmul.f32 %v1316_v47, %v1241_v48 }
 0x340   : > { %v1338_v45 = vmul.f32 %v1321_v1, %v1242_v15 }
 0x341   : > { %v1474_v62 = vadd.f32 %v1455_v25, %v1337_v2 }
 0x342   : > { %v1475_v14 = vadd.f32 %v1457_v19, %v1338_v45 }
 0x343   : > { %1490 = vst [vmem:[#allocation4 + $0x78] sm:$0xff] %v1474_v62 }
 0x344   : > { %1491 = vst [vmem:[#allocation4 + $0x28] sm:$0xff] %v1475_v14 }
 0x347   : > { %v1311_v27 = vpop.permute.xlu0 %1310 }
 0x348   : > { %v1336_v39 = vmul.f32 %v1311_v27, %v1240_v13  ;;  %1511 = sbr.rel (%p2278_p5) target bundleno = 1333 (0x535), region = 171 }
 0x34a   : > { %v1473_v8 = vadd.f32 %v1452_v54, %v1336_v39 }
 0x34c   : > { %1489 = vst [vmem:[#allocation4 + $0x70] sm:$0xff] %v1473_v8 }
 0x34d   : > { %v1542_v63 = vld [vmem:[#allocation3 + $0x70] sm:$0xff]  ;;  %v1540_v38 = vld [vmem:[#allocation3 + $0x60] sm:$0xff]  ;;  %v2655_v35 = vmov 0   ;;  %v1543_v43 = vld [vmem:[#allocation3 + $0x78] sm:$0xff]  ;;  %vm1810_vm2 = vcmask 130112   ;;  %vm1814_vm3 = vcmask 195712  }
 0x34e   : > { %v1538_v5 = vld [vmem:[#allocation3 + $0x50] sm:$0xff]  ;;  %2531 = vset.pattern.permute.xlu2 %v2655_v35  ;;  %2530 = vset.pattern.permute.xlu1 %v2655_v35  ;;  %2532 = vrcp.f32 %v1542_v63  ;;  %v1541_v60 = vld [vmem:[#allocation3 + $0x68] sm:$0xff]  ;;  %v1539_v6 = vld [vmem:[#allocation3 + $0x58] sm:$0xff]  ;;  %vm1818_vm4 = vcmask 261312   ;;  %vm1822_vm5 = vcmask 326912   ;;  %vm1826_vm6 = vcmask 392512  }
 0x34f   : > { %2529 = vset.pattern.permute.xlu0 %v2655_v35  ;;  %2534 = vrcp.f32 %v1540_v38  ;;  %v1536_v41 = vld [vmem:[#allocation3 + $0x40] sm:$0xff]  ;;  %v1537_v31 = vld [vmem:[#allocation3 + $0x48] sm:$0xff]  ;;  %v1534_v61 = vld [vmem:[#allocation3 + $0x30] sm:$0xff]  ;;  %vm1830_vm7 = vcmask 458112   ;;  %vm1834_vm8 = vcmask 523712   ;;  %vm1837_vm9 = vcmask 516096  }
 0x350   : > { %2536 = vrcp.f32 %v1538_v5  ;;  %v1535_v52 = vld [vmem:[#allocation3 + $0x38] sm:$0xff]  ;;  %v1532_v34 = vld [vmem:[#allocation3 + $0x20] sm:$0xff]  ;;  %v1533_v46 = vld [vmem:[#allocation3 + $0x28] sm:$0xff] }
 0x351   : > { %2538 = vrcp.f32 %v1543_v43  ;;  %v1530_v10 = vld [vmem:[#allocation3 + $0x10] sm:$0xff]  ;;  %v1531_v12 = vld [vmem:[#allocation3 + $0x18] sm:$0xff]  ;;  %v1528_v26 = vld [vmem:[#allocation3] sm:$0xff] }
 0x352   : > { %2540 = vrcp.f32 %v1541_v60  ;;  %v1529_v28 = vld [vmem:[#allocation3 + $0x8] sm:$0xff]  ;;  %v1672_v50 = vld [vmem:[%s3402_s4] sm:$0xff]  ;;  %v1674_v21 = vld [vmem:[%s3402_s4 + $0x10] sm:$0xff] }
 0x353   : > { %2542 = vrcp.f32 %v1539_v6  ;;  %v1673_v56 = vld [vmem:[%s3402_s4 + $0x8] sm:$0xff]  ;;  %v1675_v30 = vld [vmem:[%s3402_s4 + $0x18] sm:$0xff]  ;;  %v1676_v42 = vld [vmem:[%s3402_s4 + $0x20] sm:$0xff] }
 0x354   : > { %v2533_v58 = vpop.eup %2532  ;;  %2544 = vrcp.f32 %v1536_v41  ;;  %v1677_v11 = vld [vmem:[%s3402_s4 + $0x28] sm:$0xff]  ;;  %v1678_v22 = vld [vmem:[%s3402_s4 + $0x30] sm:$0xff]  ;;  %v1679_v49 = vld [vmem:[%s3402_s4 + $0x38] sm:$0xff] }
 0x355   : > { %v2535_v29 = vpop.eup %2534  ;;  %1632 = vperm.xlu0 %2529, %v2533_v58   ;;  %2546 = vrcp.f32 %v1537_v31  ;;  %v1526_v37 = vld [vmem:[#allocation4 + $0x78] sm:$0xff]  ;;  %v1527_v57 = vld [vmem:[#allocation4 + $0x28] sm:$0xff]  ;;  %v1524_v3 = vld [vmem:[#allocation4 + $0x60] sm:$0xff] }
 0x356   : > { %v2537_v7 = vpop.eup %2536  ;;  %1622 = vperm.xlu1 %2530, %v2535_v29   ;;  %2548 = vrcp.f32 %v1534_v61  ;;  %v1525_v15 = vld [vmem:[#allocation4 + $0x70] sm:$0xff]  ;;  %v1523_v19 = vld [vmem:[#allocation4 + $0x38] sm:$0xff]  ;;  %v1521_v63 = vld [vmem:[#allocation4 + $0x20] sm:$0xff] }
 0x357   : > { %1612 = vperm.xlu2 %2531, %v2537_v7   ;;  %v2539_v40 = vpop.eup %2538  ;;  %2550 = vrcp.f32 %v1535_v52  ;;  %v1522_v45 = vld [vmem:[#allocation4 + $0x10] sm:$0xff]  ;;  %v1520_v38 = vld [vmem:[#allocation4 + $0x40] sm:$0xff]  ;;  %v1519_v6 = vld [vmem:[#allocation4 + $0x48] sm:$0xff] }
 0x358   : > { %v2541_v55 = vpop.eup %2540  ;;  %2552 = vrcp.f32 %v1532_v34  ;;  %v1518_v29 = vld [vmem:[#allocation4 + $0x8] sm:$0xff] }
 0x359   : > { %v2543_v33 = vpop.eup %2542  ;;  %2554 = vrcp.f32 %v1533_v46  ;;  %v1517_v61 = vld [vmem:[#allocation4 + $0x68] sm:$0xff] }
 0x35a   : > { %v2545_v17 = vpop.eup %2544  ;;  %2556 = vrcp.f32 %v1530_v10  ;;  %v1514_v10 = vld [vmem:[#allocation4 + $0x58] sm:$0xff] }
 0x35b   : > { %v2547_v16 = vpop.eup %2546  ;;  %2558 = vrcp.f32 %v1531_v12 }
 0x35c   : > { %v2549_v23 = vpop.eup %2548  ;;  %2560 = vrcp.f32 %v1528_v26 }
 0x35d   : > { %1637 = vperm.xlu0 %2529, %v2539_v40   ;;  %v2551_v9 = vpop.eup %2550  ;;  %2562 = vrcp.f32 %v1529_v28  ;;  %v1512_v28 = vld [vmem:[#allocation4 + $0x30] sm:$0xff] }
 0x35e   : > { %1627 = vperm.xlu1 %2530, %v2541_v55   ;;  %v2553_v51 = vpop.eup %2552  ;;  %v1516_v55 = vld [vmem:[#allocation4 + $0x50] sm:$0xff] }
 0x35f   : > { %1617 = vperm.xlu2 %2531, %v2543_v33   ;;  %v2555_v32 = vpop.eup %2554 }
 0x360   : > { %v2557_v18 = vpop.eup %2556 }
 0x361   : > { %v2559_v54 = vpop.eup %2558 }
 0x362   : > { %v2561_v36 = vpop.eup %2560 }
 0x363   : > { %v2563_v59 = vpop.eup %2562 }
 0x365   : > { %1602 = vperm.xlu0 %2529, %v2545_v17  }
 0x366   : > { %1607 = vperm.xlu1 %2530, %v2547_v16  }
 0x367   : > { %1592 = vperm.xlu2 %2531, %v2549_v23   ;;  %v1515_v23 = vld [vmem:[#allocation4 + $0x18] sm:$0xff] }
 0x36d   : > { %1597 = vperm.xlu0 %2529, %v2551_v9  }
 0x36e   : > { %1582 = vperm.xlu1 %2530, %v2553_v51  }
 0x36f   : > { %1587 = vperm.xlu2 %2531, %v2555_v32   ;;  %v1513_v32 = vld [vmem:[#allocation4] sm:$0xff] }
 0x375   : > { %1572 = vperm.xlu0 %2529, %v2557_v18  }
 0x376   : > { %1577 = vperm.xlu1 %2530, %v2559_v54  }
 0x377   : > { %1562 = vperm.xlu2 %2531, %v2561_v36  }
 0x37d   : > { %1567 = vperm.xlu0 %2529, %v2563_v59  }
 0x37e   : > { %1682 = vperm.xlu1 %2530, %v1672_v50   ;;  %v2324_v50 = vld [vmem:[%s3401_s3] sm:$0xff] }
 0x37f   : > { %1687 = vperm.xlu2 %2531, %v1673_v56   ;;  %v2325_v56 = vld [vmem:[%s3401_s3 + $0x8] sm:$0xff] }
 0x385   : > { %1692 = vperm.xlu0 %2529, %v1674_v21   ;;  %v2326_v21 = vld [vmem:[%s3401_s3 + $0x10] sm:$0xff] }
 0x386   : > { %1697 = vperm.xlu1 %2530, %v1675_v30   ;;  %v2327_v30 = vld [vmem:[%s3401_s3 + $0x18] sm:$0xff] }
 0x387   : > { %1702 = vperm.xlu2 %2531, %v1676_v42  }
 0x38d   : > { %1707 = vperm.xlu0 %2529, %v1677_v11  }
 0x38e   : > { %1712 = vperm.xlu1 %2530, %v1678_v22  }
 0x38f   : > { %1717 = vperm.xlu2 %2531, %v1679_v49  }
 0x3b1   : > { %v1613_v44 = vpop.permute.xlu2 %1612 }
 0x3b2   : > { %v1650_v14 = vmul.f32 %v1613_v44, %v1522_v45 }
 0x3b9   : > { %v1618_v62 = vpop.permute.xlu2 %1617 }
 0x3ba   : > { %v1651_v13 = vmul.f32 %v1618_v62, %v1523_v19 }
 0x3bc   : > { %v1669_v39 = vpack.c.bf16 %v1651_v13, %v1650_v14 }
 0x3c1   : > { %v1593_v58 = vpop.permute.xlu2 %1592 }
 0x3c2   : > { %v1646_v41 = vmul.f32 %v1593_v58, %v1518_v29 }
 0x3c7   : > { %v1633_v24 = vpop.permute.xlu0 %1632 }
 0x3c8   : > { %v1623_v20 = vpop.permute.xlu1 %1622  ;;  %v1654_v0 = vmul.f32 %v1633_v24, %v1526_v37 }
 0x3c9   : > { %v1652_v47 = vmul.f32 %v1623_v20, %v1524_v3  ;;  %v1588_v52 = vpop.permute.xlu2 %1587 }
 0x3ca   : > { %v1645_v17 = vmul.f32 %v1588_v52, %v1517_v61 }
 0x3cf   : > { %v1638_v53 = vpop.permute.xlu0 %1637 }
 0x3d0   : > { %v1655_v25 = vmul.f32 %v1638_v53, %v1527_v57  ;;  %v1628_v48 = vpop.permute.xlu1 %1627 }
 0x3d1   : > { %v1653_v1 = vmul.f32 %v1628_v48, %v1525_v15  ;;  %v1563_v54 = vpop.permute.xlu2 %1562 }
 0x3d2   : > { %v1671_v4 = vpack.c.bf16 %v1655_v25, %v1654_v0  ;;  %v1640_v36 = vmul.f32 %v1563_v54, %v1512_v28 }
 0x3d3   : > { %v1670_v2 = vpack.c.bf16 %v1653_v1, %v1652_v47 }
 0x3d4   : > { %1744 = vmatpush.bf16.xpose.msra.mxu0 %v1671_v4  ;;  %2344 = vmatpush.bf16.xpose.msra.mxu1 %v1671_v4 }
 0x3d5   : > { %2345 = vmatpush.bf16.xpose.msra.mxu2 %v1671_v4  ;;  %2346 = vmatpush.bf16.xpose.msra.mxu3 %v1671_v4 }
 0x3d7   : > { %v1603_v27 = vpop.permute.xlu0 %1602 }
 0x3d8   : > { %v1608_v8 = vpop.permute.xlu1 %1607  ;;  %v1648_v35 = vmul.f32 %v1603_v27, %v1520_v38 }
 0x3d9   : > { %v1649_v5 = vmul.f32 %v1608_v8, %v1521_v63  ;;  %v1688_v11 = vpop.permute.xlu2 %1687 }
 0x3db   : > { %v1668_v43 = vpack.c.bf16 %v1649_v5, %v1648_v35 }
 0x3dc   : > { %1745 = vmatpush.bf16.xpose.msra.mxu0 %v1670_v2  ;;  %2347 = vmatpush.bf16.xpose.msra.mxu1 %v1670_v2 }
 0x3dd   : > { %2348 = vmatpush.bf16.xpose.msra.mxu2 %v1670_v2  ;;  %2349 = vmatpush.bf16.xpose.msra.mxu3 %v1670_v2 }
 0x3df   : > { %v1598_v60 = vpop.permute.xlu0 %1597 }
 0x3e0   : > { %v1647_v7 = vmul.f32 %v1598_v60, %v1519_v6  ;;  %v1583_v40 = vpop.permute.xlu1 %1582 }
 0x3e1   : > { %v1644_v33 = vmul.f32 %v1583_v40, %v1516_v55  ;;  %v1703_v25 = vpop.permute.xlu2 %1702 }
 0x3e2   : > { %v1667_v31 = vpack.c.bf16 %v1647_v7, %v1646_v41  ;;  %v1805_v7 = vlaneseq }
 0x3e3   : > { %v1666_v16 = vpack.c.bf16 %v1645_v17, %v1644_v33 }
 0x3e4   : > { %1746 = vmatpush.bf16.xpose.msra.mxu0 %v1669_v39  ;;  %2350 = vmatpush.bf16.xpose.msra.mxu1 %v1669_v39 }
 0x3e5   : > { %2351 = vmatpush.bf16.xpose.msra.mxu2 %v1669_v39  ;;  %2352 = vmatpush.bf16.xpose.msra.mxu3 %v1669_v39 }
 0x3e7   : > { %v1573_v34 = vpop.permute.xlu0 %1572 }
 0x3e8   : > { %v1578_v46 = vpop.permute.xlu1 %1577  ;;  %v1642_v12 = vmul.f32 %v1573_v34, %v1514_v10 }
 0x3e9   : > { %v1643_v9 = vmul.f32 %v1578_v46, %v1515_v23  ;;  %v1718_v19 = vpop.permute.xlu2 %1717 }
 0x3eb   : > { %v1665_v51 = vpack.c.bf16 %v1643_v9, %v1642_v12 }
 0x3ec   : > { %1747 = vmatpush.bf16.xpose.msra.mxu0 %v1668_v43  ;;  %2353 = vmatpush.bf16.xpose.msra.mxu1 %v1668_v43 }
 0x3ed   : > { %2354 = vmatpush.bf16.xpose.msra.mxu2 %v1668_v43  ;;  %2355 = vmatpush.bf16.xpose.msra.mxu3 %v1668_v43 }
 0x3ef   : > { %v1568_v26 = vpop.permute.xlu0 %1567 }
 0x3f0   : > { %v1641_v18 = vmul.f32 %v1568_v26, %v1513_v32  ;;  %v1683_v42 = vpop.permute.xlu1 %1682 }
 0x3f2   : > { %v1664_v59 = vpack.c.bf16 %v1641_v18, %v1640_v36 }
 0x3f4   : > { %1748 = vmatpush.bf16.xpose.msra.mxu0 %v1667_v31  ;;  %2356 = vmatpush.bf16.xpose.msra.mxu1 %v1667_v31 }
 0x3f5   : > { %2357 = vmatpush.bf16.xpose.msra.mxu2 %v1667_v31  ;;  %2358 = vmatpush.bf16.xpose.msra.mxu3 %v1667_v31  ;;  %v1806_v31 = vand.u32 127, %v1805_v7 }
 0x3f7   : > { %v1693_v49 = vpop.permute.xlu0 %1692  ;;  %v1808_v55 = vadd.s32 4294967288, %v1806_v31  ;;  %v1816_v10 = vadd.s32 4294967272, %v1806_v31  ;;  %v1824_v9 = vadd.s32 4294967256, %v1806_v31 }
 0x3f8   : > { %v1698_v22 = vpop.permute.xlu1 %1697 }
 0x3fc   : > { %1749 = vmatpush.bf16.xpose.msra.mxu0 %v1666_v16  ;;  %2359 = vmatpush.bf16.xpose.msra.mxu1 %v1666_v16 }
 0x3fd   : > { %2360 = vmatpush.bf16.xpose.msra.mxu2 %v1666_v16  ;;  %2361 = vmatpush.bf16.xpose.msra.mxu3 %v1666_v16  ;;  %v1812_v16 = vadd.s32 4294967280, %v1806_v31 }
 0x3ff   : > { %v1708_v62 = vpop.permute.xlu0 %1707 }
 0x400   : > { %v1713_v4 = vpop.permute.xlu1 %1712 }
 0x404   : > { %1750 = vmatpush.bf16.xpose.msra.mxu0 %v1665_v51  ;;  %2362 = vmatpush.bf16.xpose.msra.mxu1 %v1665_v51 }
 0x405   : > { %2363 = vmatpush.bf16.xpose.msra.mxu2 %v1665_v51  ;;  %2364 = vmatpush.bf16.xpose.msra.mxu3 %v1665_v51  ;;  %v1820_v51 = vadd.s32 4294967264, %v1806_v31 }
 0x40c   : > { %1751 = vmatpush.bf16.xpose.msra.mxu0 %v1664_v59  ;;  %2365 = vmatpush.bf16.xpose.msra.mxu1 %v1664_v59 }
 0x40d   : > { %2366 = vmatpush.bf16.xpose.msra.mxu2 %v1664_v59  ;;  %2367 = vmatpush.bf16.xpose.msra.mxu3 %v1664_v59 }
 0x413   : > { %1752 = vmatmul.bf16.vlgmr.msra.gmra.mxu0 %v2324_v50  ;;  %1757 = vmatmul.bf16.vlgmr.msra.gmra.mxu1 %v2325_v56  ;;  %v1828_v50 = vadd.s32 4294967248, %v1806_v31  ;;  %v1832_v56 = vadd.s32 4294967240, %v1806_v31 }
 0x414   : > { %1762 = vmatmul.bf16.vlgmr.msra.gmra.mxu2 %v2326_v21  ;;  %1767 = vmatmul.bf16.vlgmr.msra.gmra.mxu3 %v2327_v30 }
 0x490   : > { %v1753_v24 = vpop.f32.mrf.mxu0  ;;  %v1758_v20 = vpop.f32.mrf.mxu1 }
 0x491   : > { %v1754_v37 = vadd.f32 %v1753_v24, %v1683_v42  ;;  %v1759_v57 = vadd.f32 %v1758_v20, %v1693_v49 }
 0x493   : > { %1773 = vst [vmem:[%s2893_s21] sm:$0xff] %v1754_v37  ;;  %1781 = vadd.xlane.f32.xlu0 %v1754_v37  ;;  %v1841_v53 = vmul.f32 %v1759_v57, %v1759_v57  ;;  %v1839_v0 = vmul.f32 %v1754_v37, %v1754_v37 }
 0x494   : > { %1775 = vst [vmem:[%s2893_s21 + $0x10] sm:$0xff] %v1759_v57 }
 0x495   : > { %1851 = vadd.xlane.f32.xlu1 %v1841_v53  ;;  %1847 = vadd.xlane.f32.xlu2 %v1839_v0 }
 0x497   : > { %v1763_v44 = vpop.f32.mrf.mxu2  ;;  %v1768_v3 = vpop.f32.mrf.mxu3 }
 0x498   : > { %v1764_v48 = vadd.f32 %v1763_v44, %v1703_v25  ;;  %v1769_v15 = vadd.f32 %v1768_v3, %v1713_v4  ;;  %v1755_v47 = vpop.f32.mrf.mxu0  ;;  %v1760_v1 = vpop.f32.mrf.mxu1 }
 0x499   : > { %v1756_v2 = vadd.f32 %v1755_v47, %v1688_v11  ;;  %v1761_v45 = vadd.f32 %v1760_v1, %v1698_v22 }
 0x49a   : > { %1777 = vst [vmem:[%s2893_s21 + $0x20] sm:$0xff] %v1764_v48  ;;  %v1843_v38 = vmul.f32 %v1764_v48, %v1764_v48  ;;  %v1845_v5 = vmul.f32 %v1769_v15, %v1769_v15 }
 0x49b   : > { %1779 = vst [vmem:[%s2893_s21 + $0x30] sm:$0xff] %v1769_v15  ;;  %1785 = vadd.xlane.f32.xlu0 %v1759_v57  ;;  %v1842_v8 = vmul.f32 %v1761_v45, %v1761_v45  ;;  %v1840_v35 = vmul.f32 %v1756_v2, %v1756_v2 }
 0x49c   : > { %1774 = vst [vmem:[%s2893_s21 + $0x8] sm:$0xff] %v1756_v2 }
 0x49d   : > { %1776 = vst [vmem:[%s2893_s21 + $0x18] sm:$0xff] %v1761_v45  ;;  %1789 = vadd.xlane.f32.xlu1 %v1764_v48  ;;  %1793 = vadd.xlane.f32.xlu2 %v1769_v15 }
 0x49f   : > { %v1765_v14 = vpop.f32.mrf.mxu2  ;;  %v1770_v13 = vpop.f32.mrf.mxu3 }
 0x4a0   : > { %v1766_v27 = vadd.f32 %v1765_v14, %v1708_v62  ;;  %v1771_v39 = vadd.f32 %v1770_v13, %v1718_v19 }
 0x4a2   : > { %1778 = vst [vmem:[%s2893_s21 + $0x28] sm:$0xff] %v1766_v27  ;;  %v1844_v63 = vmul.f32 %v1766_v27, %v1766_v27  ;;  %v1846_v43 = vmul.f32 %v1771_v39, %v1771_v39 }
 0x4a3   : > { %1780 = vst [vmem:[%s2893_s21 + $0x38] sm:$0xff] %v1771_v39  ;;  %1853 = vadd.xlane.f32.xlu0 %v1842_v8 }
 0x4a5   : > { %1783 = vadd.xlane.f32.xlu1 %v1756_v2  ;;  %1787 = vadd.xlane.f32.xlu2 %v1761_v45 }
 0x4ab   : > { %1791 = vadd.xlane.f32.xlu0 %v1766_v27 }
 0x4ad   : > { %1857 = vadd.xlane.f32.xlu1 %v1844_v63  ;;  %1855 = vadd.xlane.f32.xlu2 %v1843_v38 }
 0x4b3   : > { %1859 = vadd.xlane.f32.xlu0 %v1845_v5 }
 0x4b5   : > { %1795 = vadd.xlane.f32.xlu1 %v1771_v39  ;;  %1849 = vadd.xlane.f32.xlu2 %v1840_v35 }
 0x4bd   : > { %1861 = vadd.xlane.f32.xlu2 %v1846_v43 }
 0x506   : > { %v1782_v60 = vpop.xlane.xlu0 %1781 }
 0x507   : > { %v1807_v34 = vperm.slane %v1782_v60, %v1806_v31 }
 0x508   : > { %v1852_v6 = vpop.xlane.xlu1 %1851  ;;  %v1848_v58 = vpop.xlane.xlu2 %1847 }
 0x509   : > { %v1871_v49 = vperm.slane %v1848_v58, %v1806_v31  ;;  %v1874_v37 = vperm.slane %v1852_v6, %v1812_v16 }
 0x50e   : > { %v1786_v29 = vpop.xlane.xlu0 %1785 }
 0x50f   : > { %v1813_v23 = vperm.slane %v1786_v29, %v1812_v16 }
 0x510   : > { %v1790_v41 = vpop.xlane.xlu1 %1789  ;;  %v1794_v40 = vpop.xlane.xlu2 %1793 }
 0x511   : > { %v1821_v59 = vperm.slane %v1790_v41, %v1820_v51  ;;  %v1829_v42 = vperm.slane %v1794_v40, %v1828_v50 }
 0x516   : > { %v1854_v61 = vpop.xlane.xlu0 %1853 }
 0x517   : > { %v1876_v53 = vperm.slane %v1854_v61, %v1816_v10 }
 0x518   : > { %v1784_v33 = vpop.xlane.xlu1 %1783  ;;  %v1788_v52 = vpop.xlane.xlu2 %1787 }
 0x519   : > { %v1809_v17 = vperm.slane %v1784_v33, %v1808_v55  ;;  %v1817_v18 = vperm.slane %v1788_v52, %v1816_v10 }
 0x51b   : > { %v1811_v46 = vsel %vm1810_vm2, %v1809_v17, %v1807_v34 }
 0x51c   : > { %v1815_v26 = vsel %vm1814_vm3, %v1813_v23, %v1811_v46 }
 0x51d   : > { %v1819_v54 = vsel %vm1818_vm4, %v1817_v18, %v1815_v26 }
 0x51e   : > { %v1792_v12 = vpop.xlane.xlu0 %1791  ;;  %v1823_v21 = vsel %vm1822_vm5, %v1821_v59, %v1819_v54 }
 0x51f   : > { %v1825_v36 = vperm.slane %v1792_v12, %v1824_v9 }
 0x520   : > { %v1858_v32 = vpop.xlane.xlu1 %1857  ;;  %v1856_v28 = vpop.xlane.xlu2 %1855 }
 0x521   : > { %v1827_v30 = vsel %vm1826_vm6, %v1825_v36, %v1823_v21  ;;  %v1878_v4 = vperm.slane %v1856_v28, %v1820_v51  ;;  %v1880_v3 = vperm.slane %v1858_v32, %v1824_v9 }
 0x522   : > { %v1831_v57 = vsel %vm1830_vm7, %v1829_v42, %v1827_v30 }
 0x526   : > { %v1860_v48 = vpop.xlane.xlu0 %1859 }
 0x527   : > { %v1882_v2 = vperm.slane %v1860_v48, %v1828_v50 }
 0x528   : > { %v1796_v11 = vpop.xlane.xlu1 %1795  ;;  %v1850_v22 = vpop.xlane.xlu2 %1849 }
 0x529   : > { %v1833_v24 = vperm.slane %v1796_v11, %v1832_v56  ;;  %v1872_v20 = vperm.slane %v1850_v22, %v1808_v55 }
 0x52b   : > { %v1835_v0 = vsel %vm1834_vm8, %v1833_v24, %v1831_v57  ;;  %v1873_v25 = vsel %vm1810_vm2, %v1872_v20, %v1871_v49 }
 0x52c   : > { %1838 = vst.msk [vmem:[%s2885_s15] sm:$0x1] %vm1837_vm9, %v1835_v0  ;;  %v1875_v44 = vsel %vm1814_vm3, %v1874_v37, %v1873_v25 }
 0x52d   : > { %v1877_v15 = vsel %vm1818_vm4, %v1876_v53, %v1875_v44 }
 0x52e   : > { %v1879_v47 = vsel %vm1822_vm5, %v1878_v4, %v1877_v15 }
 0x52f   : > { %v1881_v1 = vsel %vm1826_vm6, %v1880_v3, %v1879_v47 }
 0x530   : > { %v1862_v45 = vpop.xlane.xlu2 %1861  ;;  %v1883_v62 = vsel %vm1830_vm7, %v1882_v2, %v1881_v1 }
 0x531   : > { %v1884_v19 = vperm.slane %v1862_v45, %v1832_v56 }
 0x533   : > { %v1885_v14 = vsel %vm1834_vm8, %v1884_v19, %v1883_v62 }
 0x534   : > { %1887 = vst.msk [vmem:[%s2885_s15 + $0x1] sm:$0x1] %vm1837_vm9, %v1885_v14 }
 0x535 PF: > { %1902 = sbr.rel (!%p2782_p9) target bundleno = 1349 (0x545), region = 175  ;;  %s2296_s14 = sshll.u32 (%p2782_p9), %s2634_s27, 4  ;;  %v1949_v13 = vld [vmem:[%s2893_s21] sm:$0xff] (%p2782_p9)  ;;  %v1951_v27 = vld [vmem:[%s2893_s21 + $0x8] sm:$0xff] (%p2782_p9)  ;;  %v1953_v39 = vld [vmem:[%s2893_s21 + $0x10] sm:$0xff] (%p2782_p9) }
 0x536   : > { %s1904_s13 = sadd.s32 (%p2782_p9), %s2630_s26, %s2296_s14  ;;  %s3422_s23 = sld [smem:[#allocation15_spill]] (%p2782_p9)  ;;  %v1955_v8 = vld [vmem:[%s2893_s21 + $0x18] sm:$0xff] (%p2782_p9)  ;;  %v1957_v63 = vld [vmem:[%s2893_s21 + $0x20] sm:$0xff] (%p2782_p9)  ;;  %v1959_v38 = vld [vmem:[%s2893_s21 + $0x28] sm:$0xff] (%p2782_p9) }
 0x537   : > { %s2297_s18 = sshll.u32 (%p2782_p9), %s1904_s13, 3  ;;  %v1961_v5 = vld [vmem:[%s2893_s21 + $0x30] sm:$0xff] (%p2782_p9)  ;;  %v1963_v35 = vld [vmem:[%s2893_s21 + $0x38] sm:$0xff] (%p2782_p9) }
 0x53c   : > { %s1906_s0 = scalar_lea.vmem %s3422_s23, %s2297_s18 }
 0x53d   : > { %1950 = vst [vmem:[%s1906_s0] sm:$0xff] %v1949_v13 }
 0x53e   : > { %1952 = vst [vmem:[%s1906_s0 + $0x10] sm:$0xff] %v1951_v27 }
 0x53f   : > { %1954 = vst [vmem:[%s1906_s0 + $0x20] sm:$0xff] %v1953_v39 }
 0x540   : > { %1956 = vst [vmem:[%s1906_s0 + $0x30] sm:$0xff] %v1955_v8 }
 0x541   : > { %1958 = vst [vmem:[%s1906_s0 + $0x40] sm:$0xff] %v1957_v63 }
 0x542   : > { %1960 = vst [vmem:[%s1906_s0 + $0x50] sm:$0xff] %v1959_v38 }
 0x543   : > { %1962 = vst [vmem:[%s1906_s0 + $0x60] sm:$0xff] %v1961_v5 }
 0x544   : > { %1964 = vst [vmem:[%s1906_s0 + $0x70] sm:$0xff] %v1963_v35 }
 0x545 PF: > { %s17_s7 = sadd.s32 1, %s2650_s7   ;;  %s3423_s1 = sld [smem:[#allocation9_spill]] }
 0x546   : > { %p14_p6 = scmp.ge.s32.totalorder %s17_s7, 10   ;;  %s3424_s16 = sld [smem:[#allocation10_spill]] }
 0x547   : > { %s3425_s19 = sld [smem:[#allocation11_spill]]  ;;  %s3426_s21 = smov %s2614_s22 }
 0x548   : > { %s3427_s22 = smov %s2793_s9  ;;  %s3428_s23 = smov %s2622_s24 }
 0x549   : > { %s3429_s24 = smov %s2790_s11  ;;  %s3430_s25 = smov %s2638_s28 }
 0x54a   : > { %s3431_s26 = smov %s2642_s29  ;;  %s3432_s27 = smov %s2646_s30 }
 0x54b   : > { %s3433_s28 = smov %s3423_s1  ;;  %16 = sbr.rel (!%p14_p6) target bundleno = 10 (0xa), region = 272 }
 0x54c   : > { %s3434_s29 = smov %s3424_s16 }
 0x54d   : > { %s3435_s30 = smov %s3425_s19 }

</bundles_post_ra>
